<compile_context>
chip_gen: v7x
topology: tpu7x:2x2x1
jax: 0.10.0
libtpu: 0.0.40
codegen_flags: <defaults>
</compile_context>

<pallas_src>
import functools

import jax
import jax.numpy as jnp
from jax.experimental import pallas as pl
from jax.experimental.pallas import tpu as pltpu

RELPOS_BINS = 17  # clip(i - j, -8, 8) -> 17 bins


def _pair_embedding_kernel(bppm_ref, s_ref, rhs_ref, w1_ref, b1_ref, out_ref, lhs_ref):
    """One grid step = a (TR x TC) tile of the (L x L) pair map for one batch element.

    bppm_ref : (1, TR, TC)     pair-probability tile (native dtype, upcast in-kernel)
    s_ref    : (1, TC, m)      per-batch sequence projection, column positions
    rhs_ref  : (1, TR, K, P)   per-row packed RHS: [w2 | s[i]@wd2 | wrel + biases]
    w1_ref   : (1, H)          bppm MLP first layer weight (Linear(1, H))
    b1_ref   : (1, H)          bppm MLP first layer bias
    out_ref  : (1, TR, TC, P)
    lhs_ref  : (TR, TC, K)     VMEM scratch holding the K-concatenated LHS
    """
    f32 = jnp.float32
    TR, TC = out_ref.shape[1], out_ref.shape[2]
    H = w1_ref.shape[1]
    m = s_ref.shape[2]
    K = lhs_ref.shape[2]                       # H + m + RELPOS_BINS
    cd = lhs_ref.dtype

    row0 = pl.program_id(1) * TR
    col0 = pl.program_id(2) * TC

    # (1) bppm MLP hidden layer for the whole tile in one VPU pass:
    #     h = relu(bppm * w1 + b1); bppm may arrive as bf16 and is upcast here.
    bp = bppm_ref[0].astype(f32)                                         # (TR, TC)
    h = jnp.maximum(bp[:, :, None] * w1_ref[...] + b1_ref[...], 0.0)     # (TR, TC, H) f32
    lhs_ref[:, :, 0:H] = h.astype(cd)

    # (2) sequence projection of the column positions, broadcast to every row (OPM LHS).
    lhs_ref[:, :, H:H + m] = jnp.broadcast_to(s_ref[0][None], (TR, TC, m))

    # (3) relative-position one-hot columns; folds the relpos lookup AND all additive
    #     biases (b2 + bd2 + brel sit in the matching RHS rows) into the matmul.
    i_idx = row0 + jax.lax.broadcasted_iota(jnp.int32, (TR, TC), 0)
    j_idx = col0 + jax.lax.broadcasted_iota(jnp.int32, (TR, TC), 1)
    dist = jnp.clip(i_idx - j_idx, -8, 8) + 8                            # (TR, TC) in [0, 16]
    bins = jax.lax.broadcasted_iota(jnp.int32, (TR, TC, RELPOS_BINS), 2)
    onehot = jnp.where(dist[:, :, None] == bins, 1.0, 0.0)               # (TR, TC, 17) f32
    lhs_ref[:, :, H + m:K] = onehot.astype(cd)

    # (4) single fused batched matmul (MXU), f32 accumulation:
    #     out[r] = lhs[r] @ rhs[r]  ==  pair_embed + outer_product_mean + relpos + biases
    acc = jnp.einsum("rjk,rkp->rjp", lhs_ref[...], rhs_ref[0],
                     preferred_element_type=f32)                         # (TR, TC, P)
    out_ref[0] = acc.astype(out_ref.dtype)


def pair_embedding(seq_rep, bppm, params, *, row_tile=16, col_tile=None,
                   compute_dtype=jnp.bfloat16, out_dtype=None, out_buffers=None):
    """pair[b,i,j] = relu(bppm[b,i,j]*w1+b1)@w2 + b2
                   + OuterProductMean(s, s)@wd2 + bd2
                   + one_hot(clip(i-j,-8,8)+8)@wrel + brel,   with s = seq_rep@wd1 + bd1."""
    B, L, _ = seq_rep.shape
    H = params["w1"].shape[1]
    P = params["w2"].shape[1]
    m = params["wd1"].shape[1]
    K = H + m + RELPOS_BINS
    f32 = jnp.float32
    out_dtype = compute_dtype if out_dtype is None else out_dtype

    TR = min(row_tile, L)
    if L % TR != 0 or not (TR % 8 == 0 or TR == L):
        raise ValueError(f"row_tile={TR} must divide L={L} and be a multiple of 8 (or equal L)")
    TC = col_tile if col_tile is not None else (L if L <= 512 else 512)
    if L % TC != 0 or not (TC % 128 == 0 or TC == L):
        raise ValueError(f"col_tile={TC} must divide L={L} and be a multiple of 128 (or equal L)")

    hi = jax.lax.Precision.HIGHEST

    # Hoisted per-sequence precompute (plain XLA matmuls, O(B*L) vs the O(B*L^2*P) output).
    s = jnp.matmul(seq_rep.astype(f32), params["wd1"], precision=hi) + params["bd1"][0]   # (B,L,m)
    # wd2 rows are flattened (c, d) c-major:
    #   opm[b,i,j,p] = sum_{c,d} s[b,i,d] * s[b,j,c] * wd2[c*m + d, p]
    # -> per-row projected weights  b_proj[b,i,c,p] = sum_d s[b,i,d] * wd2[c*m + d, p]
    w_dcp = jnp.transpose(params["wd2"].reshape(m, m, P), (1, 0, 2)).reshape(m, m * P)
    b_proj = jnp.matmul(s, w_dcp, precision=hi).reshape(B, L, m, P)                       # (B,L,m,P)

    # Per-row packed RHS for the single fused matmul (K-concatenation):
    #   rows [0:H)    -> w2                        (bppm-MLP output projection)
    #   rows [H:H+m)  -> b_proj[b, i]              (outer-product-mean, row-specific)
    #   rows [H+m:K)  -> wrel + (b2 + bd2 + brel)  (relpos; matched by one-hot LHS columns)
    bias_all = params["b2"][0] + params["bd2"][0] + params["brel"][0]                     # (P,)
    w2_rows = jnp.broadcast_to(params["w2"], (B, L, H, P))
    rel_rows = jnp.broadcast_to(params["wrel"] + bias_all[None, :], (B, L, RELPOS_BINS, P))
    rhs_packed = jnp.concatenate([w2_rows, b_proj, rel_rows], axis=2).astype(compute_dtype)

    s_c = s.astype(compute_dtype)

    # VMEM budget from real block dtypes: varying blocks double-buffered (x2) with an extra
    # x2 headroom for sublane/lane padding, clamped to the chip's physical VMEM capacity.
    def _nbytes(shape, dt):
        n = 1
        for e in shape:
            n *= int(e)
        return n * jnp.dtype(dt).itemsize

    varying = (_nbytes((TR, TC), bppm.dtype) + _nbytes((TC, m), compute_dtype)
               + _nbytes((TR, K, P), compute_dtype) + _nbytes((TR, TC, P), out_dtype))
    resident = 2 * _nbytes((1, H), params["w1"].dtype)
    scratch = _nbytes((TR, TC, K), compute_dtype)
    need = 4 * varying + 4 * resident + 2 * scratch
    cap = 64 * 1024 * 1024                        # v7x physical; v5e/v6e have 128 MiB
    try:
        cap = int(getattr(pltpu.get_tpu_info(), "vmem_capacity_bytes", cap))
    except Exception:
        pass
    cap = max(cap, 64 * 1024 * 1024)
    vmem_limit = int(min(max(need, 32 * 1024 * 1024), (3 * cap) // 4))

    out_spec_kwargs = {}
    if out_buffers is not None:                   # e.g. 3 on v7x if writeback DMA is exposed
        out_spec_kwargs["pipeline_mode"] = pl.Buffered(out_buffers)
    out_spec = pl.BlockSpec((1, TR, TC, P), lambda b, i, j: (b, i, j, 0), **out_spec_kwargs)

    return pl.pallas_call(
        _pair_embedding_kernel,
        out_shape=jax.ShapeDtypeStruct((B, L, L, P), out_dtype),
        grid=(B, L // TR, L // TC),
        in_specs=[
            pl.BlockSpec((1, TR, TC), lambda b, i, j: (b, i, j)),        # bppm tile (native dtype)
            pl.BlockSpec((1, TC, m), lambda b, i, j: (b, j, 0)),         # s, column positions
            pl.BlockSpec((1, TR, K, P), lambda b, i, j: (b, i, 0, 0)),   # packed per-row RHS
            pl.BlockSpec((1, H), lambda b, i, j: (0, 0)),                # w1
            pl.BlockSpec((1, H), lambda b, i, j: (0, 0)),                # b1
        ],
        out_specs=out_spec,
        scratch_shapes=[pltpu.VMEM((TR, TC, K), compute_dtype)],
        compiler_params=pltpu.CompilerParams(
            dimension_semantics=("parallel", "parallel", "parallel"),
            vmem_limit_bytes=vmem_limit),
    )(bppm, s_c, rhs_packed, params["w1"], params["b1"])


def make_params(key, d_seq, d_pair, d_hidden, d_msa):
    ks = jax.random.split(key, 10)

    def lin_w(k, fan_in, fan_out):
        return jax.random.normal(k, (fan_in, fan_out), jnp.float32) / jnp.sqrt(float(fan_in))

    def lin_b(k, fan_out):
        return 0.1 * jax.random.normal(k, (1, fan_out), jnp.float32)

    return {
        "w1": lin_w(ks[0], 1, d_hidden),            "b1": lin_b(ks[1], d_hidden),
        "w2": lin_w(ks[2], d_hidden, d_pair),       "b2": lin_b(ks[3], d_pair),
        "wd1": lin_w(ks[4], d_seq, d_msa),          "bd1": lin_b(ks[5], d_msa),
        "wd2": lin_w(ks[6], d_msa * d_msa, d_pair), "bd2": lin_b(ks[7], d_pair),
        "wrel": lin_w(ks[8], RELPOS_BINS, d_pair),  "brel": lin_b(ks[9], d_pair),
    }


def pair_embedding_ref(seq_rep, bppm, params):
    """Plain-JAX reference mirroring the PyTorch forward pass."""
    B, L, _ = seq_rep.shape
    m = params["wd1"].shape[1]
    x = bppm[..., None]                                                  # (B, L, L, 1)
    h = jnp.maximum(x @ params["w1"] + params["b1"][0], 0.0)             # (B, L, L, H)
    pair_embed = h @ params["w2"] + params["b2"][0]                      # (B, L, L, P)

    s = seq_rep @ params["wd1"] + params["bd1"][0]                       # (B, L, m)
    outer = jnp.einsum("bid,bjc->bijcd", s, s).reshape(B, L, L, m * m)   # flatten (c, d)
    opm = outer @ params["wd2"] + params["bd2"][0]                       # (B, L, L, P)

    idx = jnp.arange(L)
    d = jnp.clip(idx[:, None] - idx[None, :], -8, 8) + 8
    onehot = jax.nn.one_hot(d, RELPOS_BINS, dtype=jnp.float32)
    rel = onehot @ params["wrel"] + params["brel"][0]                    # (L, L, P)

    return pair_embed + opm + rel[None]


def _run_case(case_idx, B, L, d_seq, d_pair, d_hidden, d_msa):
    key = jax.random.fold_in(jax.random.PRNGKey(0), case_idx)
    kp, ks, kb = jax.random.split(key, 3)
    params = make_params(kp, d_seq, d_pair, d_hidden, d_msa)
    seq_rep = jax.random.normal(ks, (B, L, d_seq), jnp.float32)
    logits = jax.random.normal(kb, (B, L, L), jnp.float32)
    bppm = jax.nn.sigmoid(logits + jnp.swapaxes(logits, 1, 2))           # symmetric, in (0, 1)

    with jax.default_matmul_precision("highest"):
        ref = pair_embedding_ref(seq_rep, bppm, params)

    # f32 compute path (f32 output): tight element-wise check of the semantics.
    f32_fn = jax.jit(functools.partial(pair_embedding, compute_dtype=jnp.float32))
    out32 = jax.block_until_ready(f32_fn(seq_rep, bppm, params))
    assert out32.shape == (B, L, L, d_pair), out32.shape
    assert out32.dtype == jnp.float32, out32.dtype
    if not jnp.allclose(out32, ref, atol=3e-3, rtol=3e-3):
        raise AssertionError(
            f"case {case_idx}: f32 mismatch, max abs err = {jnp.max(jnp.abs(out32 - ref))}")

    # bf16 perf path: bf16 bppm input, bf16 MXU operands, bf16 output. Scale-relative check.
    bf16_fn = jax.jit(functools.partial(pair_embedding, compute_dtype=jnp.bfloat16))
    out16 = jax.block_until_ready(bf16_fn(seq_rep, bppm.astype(jnp.bfloat16), params))
    assert out16.dtype == jnp.bfloat16, out16.dtype
    err = jnp.max(jnp.abs(out16.astype(jnp.float32) - ref)) / (jnp.max(jnp.abs(ref)) + 1e-6)
    if err > 4e-2:
        raise AssertionError(f"case {case_idx}: bf16 mismatch, scaled max err = {err}")


if __name__ == "__main__":
    # small shapes; case 1 exercises a lane-dense P=128 output and a multi-step row grid.
    _run_case(0, B=2, L=16, d_seq=32, d_pair=64, d_hidden=32, d_msa=16)
    _run_case(1, B=1, L=64, d_seq=48, d_pair=128, d_hidden=32, d_msa=32)
    print("KERNEL_OK")
</pallas_src>

<mosaic_0001>
module attributes {stable_mosaic.version = 11 : i64} {
  func.func @_pair_embedding_kernel(%arg0: i32, %arg1: i32, %arg2: i32, %arg3: memref<1x16x16xf32, #tpu.memory_space<vmem>>, %arg4: memref<1x16x16xf32, #tpu.memory_space<vmem>>, %arg5: memref<1x16x65x64xf32, #tpu.memory_space<vmem>>, %arg6: memref<1x32xf32, #tpu.memory_space<vmem>>, %arg7: memref<1x32xf32, #tpu.memory_space<vmem>>, %arg8: memref<1x16x16x64xf32, #tpu.memory_space<vmem>>, %arg9: memref<16x16x65xf32, #tpu.memory_space<vmem>>) attributes {dimension_semantics = [#tpu.dimension_semantics<parallel>, #tpu.dimension_semantics<parallel>, #tpu.dimension_semantics<parallel>], iteration_bounds = array<i64: 2, 1, 1>, scalar_prefetch = 0 : i64, scratch_operands = 1 : i64, tpu.core_type = #tpu.core_type<tc>, window_params = [{transform_indices = @transform_0, window_bounds = array<i64: 1, 16, 16>}, {transform_indices = @transform_1, window_bounds = array<i64: 1, 16, 16>}, {transform_indices = @transform_2, window_bounds = array<i64: 1, 16, 65, 64>}, {pipeline_mode = #tpu.pipeline_mode<synchronous>, transform_indices = @transform_3, window_bounds = array<i64: 1, 32>}, {pipeline_mode = #tpu.pipeline_mode<synchronous>, transform_indices = @transform_4, window_bounds = array<i64: 1, 32>}, {transform_indices = @transform_5, window_bounds = array<i64: 1, 16, 16, 64>}]} {
    %c16_i32 = arith.constant 16 : i32
    %0 = arith.muli %arg1, %c16_i32 : i32
    %c16_i32_0 = arith.constant 16 : i32
    %1 = arith.muli %arg2, %c16_i32_0 : i32
    %c0 = arith.constant 0 : index
    %c0_1 = arith.constant 0 : index
    %c0_2 = arith.constant 0 : index
    %2 = vector.load %arg3[%c0, %c0_1, %c0_2] : memref<1x16x16xf32, #tpu.memory_space<vmem>>, vector<1x16x16xf32>
    %3 = vector.shape_cast %2 : vector<1x16x16xf32> to vector<16x16xf32>
    %4 = vector.shape_cast %3 : vector<16x16xf32> to vector<16x16x1xf32>
    %c0_3 = arith.constant 0 : index
    %c0_4 = arith.constant 0 : index
    %5 = vector.load %arg6[%c0_3, %c0_4] : memref<1x32xf32, #tpu.memory_space<vmem>>, vector<1x32xf32>
    %6 = vector.shape_cast %5 : vector<1x32xf32> to vector<1x1x32xf32>
    %7 = vector.broadcast %4 : vector<16x16x1xf32> to vector<16x16x32xf32>
    %8 = vector.broadcast %6 : vector<1x1x32xf32> to vector<16x16x32xf32>
    %9 = arith.mulf %7, %8 : vector<16x16x32xf32>
    %c0_5 = arith.constant 0 : index
    %c0_6 = arith.constant 0 : index
    %10 = vector.load %arg7[%c0_5, %c0_6] : memref<1x32xf32, #tpu.memory_space<vmem>>, vector<1x32xf32>
    %11 = vector.shape_cast %10 : vector<1x32xf32> to vector<1x1x32xf32>
    %12 = vector.broadcast %11 : vector<1x1x32xf32> to vector<16x16x32xf32>
    %13 = arith.addf %9, %12 : vector<16x16x32xf32>
    %cst = arith.constant 0.000000e+00 : f32
    %14 = vector.broadcast %cst : f32 to vector<16x16x32xf32>
    %15 = arith.maximumf %13, %14 : vector<16x16x32xf32>
    %c0_7 = arith.constant 0 : index
    %c0_8 = arith.constant 0 : index
    %c0_9 = arith.constant 0 : index
    %16 = vector.load %arg9[%c0_7, %c0_8, %c0_9] : memref<16x16x65xf32, #tpu.memory_space<vmem>>, vector<16x16x32xf32>
    tpu.vector_store %arg9[%c0_7, %c0_8, %c0_9], %15 {strides = array<i32>} : memref<16x16x65xf32, #tpu.memory_space<vmem>>, vector<16x16x32xf32>,
    %c0_10 = arith.constant 0 : index
    %c0_11 = arith.constant 0 : index
    %c0_12 = arith.constant 0 : index
    %17 = vector.load %arg4[%c0_10, %c0_11, %c0_12] : memref<1x16x16xf32, #tpu.memory_space<vmem>>, vector<1x16x16xf32>
    %18 = vector.shape_cast %17 : vector<1x16x16xf32> to vector<16x16xf32>
    %19 = vector.shape_cast %18 : vector<16x16xf32> to vector<1x16x16xf32>
    %20 = vector.shape_cast %19 : vector<1x16x16xf32> to vector<1x16x16xf32>
    %21 = vector.broadcast %20 : vector<1x16x16xf32> to vector<16x16x16xf32>
    %c0_13 = arith.constant 0 : index
    %c0_14 = arith.constant 0 : index
    %c32 = arith.constant 32 : index
    %22 = vector.load %arg9[%c0_13, %c0_14, %c32] : memref<16x16x65xf32, #tpu.memory_space<vmem>>, vector<16x16x16xf32>
    tpu.vector_store %arg9[%c0_13, %c0_14, %c32], %21 {strides = array<i32>} : memref<16x16x65xf32, #tpu.memory_space<vmem>>, vector<16x16x16xf32>,
    %23 = tpu.iota {dimensions = array<i32: 0>} : vector<16x16xi32>
    %24 = vector.broadcast %0 : i32 to vector<16x16xi32>
    %25 = arith.addi %24, %23 : vector<16x16xi32>
    %26 = tpu.iota {dimensions = array<i32: 1>} : vector<16x16xi32>
    %27 = vector.broadcast %1 : i32 to vector<16x16xi32>
    %28 = arith.addi %27, %26 : vector<16x16xi32>
    %29 = arith.subi %25, %28 : vector<16x16xi32>
    %c-8_i32 = arith.constant -8 : i32
    %c8_i32 = arith.constant 8 : i32
    %30 = vector.broadcast %c-8_i32 : i32 to vector<16x16xi32>
    %31 = arith.maxsi %30, %29 : vector<16x16xi32>
    %32 = vector.broadcast %c8_i32 : i32 to vector<16x16xi32>
    %33 = arith.minsi %32, %31 : vector<16x16xi32>
    %c8_i32_15 = arith.constant 8 : i32
    %34 = vector.broadcast %c8_i32_15 : i32 to vector<16x16xi32>
    %35 = arith.addi %33, %34 : vector<16x16xi32>
    %36 = tpu.iota {dimensions = array<i32: 2>} : vector<16x16x17xi32>
    %37 = vector.shape_cast %35 : vector<16x16xi32> to vector<16x16x1xi32>
    %38 = vector.broadcast %37 : vector<16x16x1xi32> to vector<16x16x17xi32>
    %39 = arith.cmpi eq, %38, %36 : vector<16x16x17xi32>
    %cst_16 = arith.constant 1.000000e+00 : f32
    %cst_17 = arith.constant 0.000000e+00 : f32
    %40 = vector.broadcast %cst_16 : f32 to vector<16x16x17xf32>
    %41 = vector.broadcast %cst_17 : f32 to vector<16x16x17xf32>
    %42 = arith.select %39, %40, %41 : vector<16x16x17xi1>, vector<16x16x17xf32>
    %c0_18 = arith.constant 0 : index
    %c0_19 = arith.constant 0 : index
    %c48 = arith.constant 48 : index
    %43 = vector.load %arg9[%c0_18, %c0_19, %c48] : memref<16x16x65xf32, #tpu.memory_space<vmem>>, vector<16x16x17xf32>
    tpu.vector_store %arg9[%c0_18, %c0_19, %c48], %42 {strides = array<i32>} : memref<16x16x65xf32, #tpu.memory_space<vmem>>, vector<16x16x17xf32>,
    %c0_20 = arith.constant 0 : index
    %c0_21 = arith.constant 0 : index
    %c0_22 = arith.constant 0 : index
    %44 = vector.load %arg9[%c0_20, %c0_21, %c0_22] : memref<16x16x65xf32, #tpu.memory_space<vmem>>, vector<16x16x65xf32>
    %c0_23 = arith.constant 0 : index
    %c0_24 = arith.constant 0 : index
    %c0_25 = arith.constant 0 : index
    %c0_26 = arith.constant 0 : index
    %45 = vector.load %arg5[%c0_23, %c0_24, %c0_25, %c0_26] : memref<1x16x65x64xf32, #tpu.memory_space<vmem>>, vector<1x16x65x64xf32>
    %46 = vector.shape_cast %45 : vector<1x16x65x64xf32> to vector<16x65x64xf32>
    "tpu.trace_start"() <{level = 10 : i32, message = "rjk,rkp->rjp"}> : () -> ()
    %cst_27 = arith.constant dense<0.000000e+00> : vector<16x16x64xf32>
    %47 = tpu.matmul %44, %46, %cst_27 {dimension_numbers = #tpu.dot_dimension_numbers<[2], [1], [1], [2], [0, 0, 0, 1, 1, 2], [0], [0]>} : vector<16x16x65xf32>, vector<16x65x64xf32>, vector<16x16x64xf32> -> vector<16x16x64xf32>
    "tpu.trace_stop"() : () -> ()
    %c0_28 = arith.constant 0 : index
    %c0_29 = arith.constant 0 : index
    %c0_30 = arith.constant 0 : index
    %c0_31 = arith.constant 0 : index
    %48 = vector.load %arg8[%c0_28, %c0_29, %c0_30, %c0_31] : memref<1x16x16x64xf32, #tpu.memory_space<vmem>>, vector<1x16x16x64xf32>
    %49 = vector.shape_cast %48 : vector<1x16x16x64xf32> to vector<16x16x64xf32>
    %50 = vector.shape_cast %47 : vector<16x16x64xf32> to vector<1x16x16x64xf32>
    tpu.vector_store %arg8[%c0_28, %c0_29, %c0_30, %c0_31], %50 {strides = array<i32>} : memref<1x16x16x64xf32, #tpu.memory_space<vmem>>, vector<1x16x16x64xf32>,
    return
  }
  func.func @transform_0(%arg0: i32, %arg1: i32, %arg2: i32) -> (i32, i32, i32) {
    %c0_i32 = arith.constant 0 : i32
    return %arg0, %arg1, %arg2 : i32, i32, i32
  }
  func.func @transform_1(%arg0: i32, %arg1: i32, %arg2: i32) -> (i32, i32, i32) {
    %c0_i32 = arith.constant 0 : i32
    %c0_i32_0 = arith.constant 0 : i32
    return %arg0, %arg2, %c0_i32 : i32, i32, i32
  }
  func.func @transform_2(%arg0: i32, %arg1: i32, %arg2: i32) -> (i32, i32, i32, i32) {
    %c0_i32 = arith.constant 0 : i32
    %c0_i32_0 = arith.constant 0 : i32
    %c0_i32_1 = arith.constant 0 : i32
    return %arg0, %arg1, %c0_i32, %c0_i32_0 : i32, i32, i32, i32
  }
  func.func @transform_3(%arg0: i32, %arg1: i32, %arg2: i32) -> (i32, i32) {
    %c0_i32 = arith.constant 0 : i32
    %c0_i32_0 = arith.constant 0 : i32
    %c0_i32_1 = arith.constant 0 : i32
    return %c0_i32, %c0_i32_0 : i32, i32
  }
  func.func @transform_4(%arg0: i32, %arg1: i32, %arg2: i32) -> (i32, i32) {
    %c0_i32 = arith.constant 0 : i32
    %c0_i32_0 = arith.constant 0 : i32
    %c0_i32_1 = arith.constant 0 : i32
    return %c0_i32, %c0_i32_0 : i32, i32
  }
  func.func @transform_5(%arg0: i32, %arg1: i32, %arg2: i32) -> (i32, i32, i32, i32) {
    %c0_i32 = arith.constant 0 : i32
    %c0_i32_0 = arith.constant 0 : i32
    return %arg0, %arg1, %arg2, %c0_i32 : i32, i32, i32, i32
  }
}

</mosaic_0001>

<bundles_post_ra>
// kernel: pair_embedding.1
= control target key start
LH: loop header
LB: loop body
LE: loop exit
PB: predicated region body
PF: predicated region fallthrough
CT: control target
= control target key end

     0   :  { %10 = vsyncpa [#allocation4], 0  ;;  %s4757_s0 = inlined_call_operand.vmem [shape: f32[2,16,16], index: 0, kind: input, shape index: {}]   ;;  %s4758_s1 = inlined_call_operand.vmem [shape: f32[2,16,16], index: 1, kind: input, shape index: {}]   ;;  %s4759_s2 = inlined_call_operand.vmem [shape: f32[2,16,65,64], index: 2, kind: input, shape index: {}]   ;;  %s4760_s3 = inlined_call_operand.vmem [shape: f32[1,32], index: 3, kind: input, shape index: {}]   ;;  %s4761_s4 = inlined_call_operand.vmem [shape: f32[1,32], index: 4, kind: input, shape index: {}]   ;;  %s4762_s5 = inlined_call_operand.hbm [shape: f32[2,16,16,64], index: 5, kind: output, shape index: {}]  }
   0x1   :  { %12 = vsyncpa [#allocation4 + $0x1], 0  ;;  %s3935_s18 = smov 0   ;;  %s3937_s19 = smov 0  }
   0x2   :  { %s3939_s20 = smov 0   ;;  %s3941_s21 = smov 0  }
   0x3   :  { %s3943_s22 = smov 0   ;;  %s3945_s23 = smov 0  }
   0x4 LB: > { %s2839_s24 = sadd.s32 4294967295, %s3897_s23   ;;  %s2840_s25 = sadd.s32 4294967294, %s3897_s23   ;;  %s3897_s23 = sphi %s3945_s23, %s18_s23   ;;  %s3893_s22 = sphi %s3943_s22, %s4769_s22   ;;  %s3889_s21 = sphi %s3941_s21, %s4768_s21   ;;  %s3885_s20 = sphi %s3939_s20, %s4767_s20   ;;  %s3881_s19 = sphi %s3937_s19, %s4766_s19   ;;  %s3877_s18 = sphi %s3935_s18, %s4765_s18  }
   0x5   : > { %s37_s26 = sadd.s32 1, %s3893_s22  ;;  %s176_s27 = sadd.s32 1, %s3885_s20 }
   0x6   : > { %p39_p0 = scmp.ge.s32.totalorder %s37_s26, 2  ;;  %p186_p1 = scmp.ne.s32.totalorder %s3885_s20, %s3881_s19 }
   0x7   : > { %p187_p2 = scmp.eq.s32.totalorder %s2839_s24, 1  ;;  %p192_p3 = scmp.ne.s32.totalorder %s3881_s19, %s3877_s18 }
   0x8   : > { %s4771_s26 = smov (%p39_p0, %s37_s26), 0  ;;  %p193_p5 = scmp.eq.s32.totalorder %s2840_s25, 1 }
   0x9   : > { %p3975_p4 = por %p187_p2, %p186_p1  ;;  %s169_s29 = ssub.s32 %s3893_s22, %s4771_s26 }
   0xa   : > { %p2843_p6 = scmp.ge.s32.totalorder %s3897_s23, 1  ;;  %p174_p7 = scmp.eq.s32.totalorder %s169_s29, 0 }
   0xb   : > { %p3982_p8 = por %p193_p5, %p192_p3  ;;  %p260_p9 = scmp.lt.s32.totalorder %s3897_s23, 3 }
   0xc   : > { %s3988_s6 = scalar_select %p174_p7, %s3885_s20, %s176_s27  }
   0xd   : > { %p261_p10 = pnand %p2843_p6, %p260_p9 }
   0xe   : > { %v354_v0 = vlaneseq (!%p261_p10)  ;;  %p315_p11 = scmp.lt.s32.totalorder (!%p261_p10), %s3889_s21, 1  ;;  %s3899_s15 = smov (!%p261_p10), 32   ;;  %vm1322_vm5 = vcmask (!%p261_p10), 1040384   ;;  %vm640_vm12 = vcmask (!%p261_p10), 261120  }
   0xf   : > { %264 = sbr.rel (%p261_p10) target bundleno = 690 (0x2b2), region = 40  ;;  %s3901_s27 = smov (!%p261_p10), 48  }
  0x10   : > { %v355_v1 = vshrl.u32 (!%p261_p10), %v354_v0, 7  ;;  %v3990_v2 = vand.u32 (!%p261_p10), 127, %v354_v0  ;;  %s2907_s17 = sshll.u32 (!%p261_p10), %s3889_s21, 12 }
  0x11   : > { %s4697_s29 = scalar_lea.hbm (!%p261_p10), %s4762_s5, %s2907_s17 }
  0x12   : > { %v726_v3 = vsub.s32 (!%p261_p10), %v355_v1, %v3990_v2  ;;  %v3993_v4 = vsub.s32 (!%p261_p10), 0, %v355_v1  ;;  %v3995_v7 = vsub.s32 (!%p261_p10), 1, %v355_v1  ;;  %v718_v8 = vadd.s32 (!%p261_p10), 8, %v355_v1 }
  0x13   : > { %v3999_v11 = vsub.s32 (!%p261_p10), 3, %v355_v1  ;;  %v4001_v12 = vsub.s32 (!%p261_p10), 2, %v355_v1  ;;  %v4012_v19 = vsub.s32 (!%p261_p10), 5, %v355_v1  ;;  %v4014_v20 = vsub.s32 (!%p261_p10), 4, %v355_v1 }
  0x14   : > { %vm728_vm0 = vcmp.gt.s32.totalorder (!%p261_p10), %v726_v3, 4294967288  ;;  %v727_v13 = vsub.s32 (!%p261_p10), %v718_v8, %v3990_v2  ;;  %v4039_v28 = vsub.s32 (!%p261_p10), 7, %v355_v1  ;;  %v4041_v29 = vsub.s32 (!%p261_p10), 6, %v355_v1 }
  0x15   : > { %v729_v5 = vsel (!%p261_p10), %vm728_vm0, %v726_v3, 4294967288  ;;  %v3900_v3 = vmov (!%p261_p10), 0.0  }
  0x16   : > { %v736_v6 = vadd.s32 8, %v729_v5  ;;  %vm730_vm1 = vcmp.gt.s32.totalorder %v727_v13, 4294967288  ;;  %s4010_s7 = scalar_select %p315_p11, %s3889_s21, 1 }
  0x17   : > { %v731_v14 = vsel %vm730_vm1, %v727_v13, 4294967288  ;;  %vm683_vm1 = vcmask 392448  }
  0x18   : > { %v741_v9 = vrot.slane %v736_v6, %v3993_v4  ;;  %v752_v10 = vrot.slane %v736_v6, %v3995_v7  ;;  %v774_v15 = vrot.slane %v736_v6, %v3999_v11  ;;  %v763_v16 = vrot.slane %v736_v6, %v4001_v12  ;;  %s2905_s8 = sshll.u32 %s4010_s7, 4  ;;  %s3676_s16 = smul.u32 1152, %s4010_s7 }
  0x19   : > { %vm734_vm2 = vcmp.lt.s32.totalorder %v731_v14, 8  ;;  %v796_v23 = vrot.slane %v736_v6, %v4012_v19  ;;  %v785_v24 = vrot.slane %v736_v6, %v4014_v20  ;;  %s4030_s11 = scalar_lea.vmem %s4757_s0, %s2905_s8  ;;  %v818_v30 = vrot.slane %v736_v6, %v4039_v28  ;;  %s335_s14 = scalar_lea.vmem %s4758_s1, %s2905_s8 }
  0x1a   : > { %747 = vbcast.lane.b32.xlu1 %v741_v9, 264  ;;  %743 = vbcast.lane.b32.xlu0 %v741_v9, 256  ;;  %v735_v17 = vsel %vm734_vm2, %v731_v14, 8  ;;  %v4033_v25 = vld [vmem:[%s4030_s11] sm:$0xff]  ;;  %v807_v31 = vrot.slane %v736_v6, %v4041_v29  ;;  %v674_v32 = vld [vmem:[%s335_s14 + $0x8] sm:$0xff]  ;;  %s4056_s25 = scalar_lea.vmem %s4759_s2, %s3676_s16  ;;  %s3902_s8 = smov [#allocation3]  }
  0x1b   : > { %v4007_v18 = vadd.s32 8, %v735_v17  ;;  %v368_v26 = vrot.slane %v4033_v25, %v3995_v7  ;;  %v357_v27 = vrot.slane %v4033_v25, %v3993_v4  ;;  %v673_v33 = vld [vmem:[%s335_s14] sm:$0xff]  ;;  %v390_v34 = vrot.slane %v4033_v25, %v3999_v11  ;;  %v1172_v37 = vld [vmem:[%s4056_s25 + $0x8] sm:$0xff]  ;;  %v1181_v40 = vld [vmem:[%s4056_s25 + $0x50] sm:$0xff]  ;;  %s311_s14 = sand.u32 1, %s3881_s19   ;;  %s3823_s9 = sshll.u32 %s3902_s8, 4  ;;  %s3824_s9 = int_to_ptr.vmem [resolvable:$false] %s3823_s9 }
  0x1c   : > { %v379_v35 = vrot.slane %v4033_v25, %v4001_v12  ;;  %v1171_v36 = vld [vmem:[%s4056_s25] sm:$0xff]  ;;  %v1180_v38 = vld [vmem:[%s4056_s25 + $0x48] sm:$0xff]  ;;  %v1173_v41 = vld [vmem:[%s4056_s25 + $0x10] sm:$0xff]  ;;  %s4711_s21 = scalar_lea.sflag [#allocation4], %s311_s14  ;;  %s3825_s10 = scalar_lea.vmem %s3824_s9, 8192 }
  0x1d   : > { %v4018_v21 = vrot.slane %v4007_v18, %v3995_v7  ;;  %v4022_v22 = vrot.slane %v4007_v18, %v3993_v4  ;;  %v3420_v39 = vpack.c.bf16 %v1172_v37, %v1171_v36  ;;  %v1174_v42 = vld [vmem:[%s4056_s25 + $0x18] sm:$0xff]  ;;  %v3436_v43 = vpack.c.bf16 %v1181_v40, %v1180_v38  ;;  %v1183_v46 = vld [vmem:[%s4056_s25 + $0x60] sm:$0xff]  ;;  %v1176_v49 = vld [vmem:[%s4056_s25 + $0x28] sm:$0xff] }
  0x1e   : > { %758 = vbcast.lane.b32.xlu1 %v752_v10, 264  ;;  %754 = vbcast.lane.b32.xlu0 %v752_v10, 256  ;;  %v3424_v44 = vpack.c.bf16 %v1174_v42, %v1173_v41  ;;  %v1182_v45 = vld [vmem:[%s4056_s25 + $0x58] sm:$0xff]  ;;  %v1175_v48 = vld [vmem:[%s4056_s25 + $0x20] sm:$0xff]  ;;  %v1184_v50 = vld [vmem:[%s4056_s25 + $0x68] sm:$0xff] }
  0x1f   : > { %3421 = vmatprep.subr.bf16.mxu0 %v3420_v39  ;;  %v3440_v47 = vpack.c.bf16 %v1183_v46, %v1182_v45  ;;  %3437 = vmatprep.subr.bf16.mxu1 %v3436_v43  ;;  %v3428_v51 = vpack.c.bf16 %v1176_v49, %v1175_v48  ;;  %v1185_v52 = vld [vmem:[%s4056_s25 + $0x70] sm:$0xff]  ;;  %v1178_v55 = vld [vmem:[%s4056_s25 + $0x38] sm:$0xff]  ;;  %v1187_v58 = vld [vmem:[%s4056_s25 + $0x80] sm:$0xff] }
  0x20   : > { %3423 = vmatpush3.bf16.msra.mxu0 %v3420_v39  ;;  %3439 = vmatpush3.bf16.msra.mxu1 %v3436_v43  ;;  %v3444_v53 = vpack.c.bf16 %v1185_v52, %v1184_v50  ;;  %v1177_v54 = vld [vmem:[%s4056_s25 + $0x30] sm:$0xff]  ;;  %v1186_v56 = vld [vmem:[%s4056_s25 + $0x78] sm:$0xff]  ;;  %v1179_v0 = vld [vmem:[%s4056_s25 + $0x40] sm:$0x1]  ;;  %v862_v50 = vrot.slane %v4007_v18, %v3999_v11 }
  0x21   : > { %3425 = vmatprep.subr.bf16.mxu0 %v3424_v44  ;;  %3441 = vmatprep.subr.bf16.mxu1 %v3440_v47  ;;  %v3432_v57 = vpack.c.bf16 %v1178_v55, %v1177_v54  ;;  %v3448_v61 = vpack.c.bf16 %v1187_v58, %v1186_v56  ;;  %v1188_v1 = vld [vmem:[%s4056_s25 + $0x88] sm:$0x1]  ;;  %v1189_v10 = vld [vmem:[%s4056_s25 + $0x90] sm:$0xff]  ;;  %v1190_v13 = vld [vmem:[%s4056_s25 + $0x98] sm:$0xff] }
  0x22   : > { %776 = vbcast.lane.b32.xlu1 %v774_v15, 256  ;;  %765 = vbcast.lane.b32.xlu0 %v763_v16, 256  ;;  %v1198_v14 = vld [vmem:[%s4056_s25 + $0xd8] sm:$0xff]  ;;  %v4091_v17 = vpack.c.bf16 %v1190_v13, %v1189_v10  ;;  %v4121_v38 = vld [vmem:[%s4760_s3] ss:$0 sm:$0xff] }
  0x23   : > { %v4128_v41 = vld [vmem:[%s4761_s4] ss:$0 sm:$0xff] }
  0x24   : > { %3427 = vmatpush3.bf16.msra.mxu0 %v3424_v44  ;;  %3443 = vmatpush3.bf16.msra.mxu1 %v3440_v47 }
  0x25   : > { %3429 = vmatprep.subr.bf16.mxu0 %v3428_v51  ;;  %3445 = vmatprep.subr.bf16.mxu1 %v3444_v53 }
  0x26   : > { %780 = vbcast.lane.b32.xlu1 %v774_v15, 264  ;;  %769 = vbcast.lane.b32.xlu0 %v763_v16, 264 }
  0x28   : > { %3431 = vmatpush3.bf16.msra.mxu0 %v3428_v51  ;;  %3447 = vmatpush3.bf16.msra.mxu1 %v3444_v53  ;;  %v851_v51 = vrot.slane %v4007_v18, %v4001_v12 }
  0x29   : > { %3433 = vmatprep.subr.bf16.mxu0 %v3432_v57  ;;  %3449 = vmatprep.subr.bf16.mxu1 %v3448_v61 }
  0x2a   : > { %798 = vbcast.lane.b32.xlu1 %v796_v23, 256  ;;  %787 = vbcast.lane.b32.xlu0 %v785_v24, 256 }
  0x2c   : > { %3435 = vmatpush3.bf16.msra.mxu0 %v3432_v57  ;;  %3451 = vmatpush3.bf16.msra.mxu1 %v3448_v61 }
  0x2d   : > { %3100 = vmatprep.subr.msk.mxu0 %vm1322_vm5, %v1179_v0  ;;  %3121 = vmatprep.subr.msk.mxu1 %vm1322_vm5, %v1188_v1 }
  0x2e   : > { %802 = vbcast.lane.b32.xlu1 %v796_v23, 264  ;;  %791 = vbcast.lane.b32.xlu0 %v785_v24, 264  ;;  %v1199_v23 = vld [vmem:[%s4056_s25 + $0xe0] sm:$0xff] }
  0x30   : > { %3101 = vmatpush3.msk.msra.mxu0 %vm1322_vm5, %v1179_v0  ;;  %3122 = vmatpush3.msk.msra.mxu1 %vm1322_vm5, %v1188_v1  ;;  %v434_v0 = vrot.slane %v4033_v25, %v4039_v28 }
  0x31   : > { %3453 = vmatprep.subr.bf16.mxu0 %v4091_v17 }
  0x32   : > { %370 = vbcast.lane.b32.xlu1 %v368_v26, 256  ;;  %359 = vbcast.lane.b32.xlu0 %v357_v27, 256 }
  0x36   : > { %374 = vbcast.lane.b32.xlu1 %v368_v26, 264  ;;  %363 = vbcast.lane.b32.xlu0 %v357_v27, 264  ;;  %v4094_v27 = vpack.c.bf16 %v1199_v23, %v1198_v14 }
  0x38   : > { %3469 = vmatprep.subr.bf16.mxu1 %v4094_v27 }
  0x3a   : > { %820 = vbcast.lane.b32.xlu1 %v818_v30, 256  ;;  %809 = vbcast.lane.b32.xlu0 %v807_v31, 256 }
  0x3e   : > { %824 = vbcast.lane.b32.xlu1 %v818_v30, 264  ;;  %813 = vbcast.lane.b32.xlu0 %v807_v31, 264 }
  0x42   : > { %679 = vrot.lane.b32.xlu1 %v674_v32, %s3899_s15  ;;  %677 = vrot.lane.b32.xlu0 %v673_v33, %s3899_s15  ;;  %s2844_s15 = sshll.u32 %s311_s14, 8 }
  0x43   : > { %s4634_s16 = scalar_lea.vmem [#allocation3], %s2844_s15 }
  0x44   : > { %s2713_s24 = sshll.u32 %s4634_s16, 4  ;;  %s4699_s24 = int_to_ptr.vmem [resolvable:$true] %s2713_s24 }
  0x45   : > { %s3819_s7 = scalar_lea.vmem %s4699_s24, 4096  ;;  %p3826_p1 = scmp.lt.s32.totalorder %s4699_s24, %s3824_s9 }
  0x46   : > { %392 = vbcast.lane.b32.xlu1 %v390_v34, 256  ;;  %381 = vbcast.lane.b32.xlu0 %v379_v35, 256  ;;  %p3820_p12 = scmp.ne.s32.totalorder %s4699_s24, %s3819_s7  ;;  %p3827_p2 = scmp.lt.s32.totalorder %s3825_s10, %s3819_s7 }
  0x48   : > { %p3821_p13 = pnand %p3820_p12, %p3975_p4  ;;  %p3828_p3 = por %p3827_p2, %p3826_p1 }
  0x4a   : > { %396 = vbcast.lane.b32.xlu1 %v390_v34, 264  ;;  %385 = vbcast.lane.b32.xlu0 %v379_v35, 264  ;;  %v412_v34 = vrot.slane %v4033_v25, %v4012_v19  ;;  %v401_v35 = vrot.slane %v4033_v25, %v4014_v20  ;;  %p3822_p0 = pneg %p3821_p13 }
  0x4c   : > { %p3829_p5 = pnand %p3828_p3, %p3822_p0 }
  0x8c   : > { %v748_v59 = vpop.permute.xlu1 %747  ;;  %v744_v60 = vpop.permute.xlu0 %743 }
  0x8d   : > { %vm915_vm3 = vcmp.eq.s32.totalorder %v748_v59, %v3990_v2  ;;  %vm914_vm4 = vcmp.eq.s32.totalorder %v744_v60, %v3990_v2 }
  0x8e   : > { %v947_v5 = vsel %vm915_vm3, 1.0, %v3900_v3  ;;  %v946_v6 = vsel %vm914_vm4, 1.0, %v3900_v3 }
  0x90   : > { %v759_v62 = vpop.permute.xlu1 %758  ;;  %v755_v63 = vpop.permute.xlu0 %754 }
  0x91   : > { %vm917_vm6 = vcmp.eq.s32.totalorder %v759_v62, %v3990_v2  ;;  %vm916_vm7 = vcmp.eq.s32.totalorder %v755_v63, %v3990_v2 }
  0x92   : > { %v949_v8 = vsel %vm917_vm6, 1.0, %v3900_v3  ;;  %v948_v9 = vsel %vm916_vm7, 1.0, %v3900_v3  ;;  %vm1106_vm7 = vcmask 531840  }
  0x93   : > { %v3742_v15 = vpack.i.bf16 %v949_v8, %v947_v5  ;;  %v3737_v16 = vpack.i.bf16 %v948_v9, %v946_v6  ;;  %v423_v6 = vrot.slane %v4033_v25, %v4041_v29 }
  0x94   : > { %v777_v24 = vpop.permute.xlu1 %776  ;;  %v766_v26 = vpop.permute.xlu0 %765 }
  0x95   : > { %3743 = vrot.lane.b32.xlu1 %v3742_v15, %s3901_s27  ;;  %3738 = vrot.lane.b32.xlu0 %v3737_v16, %s3901_s27  ;;  %vm920_vm10 = vcmp.eq.s32.totalorder %v777_v24, %v3990_v2  ;;  %vm918_vm11 = vcmp.eq.s32.totalorder %v766_v26, %v3990_v2 }
  0x96   : > { %v952_v39 = vsel %vm920_vm10, 1.0, %v3900_v3  ;;  %v950_v40 = vsel %vm918_vm11, 1.0, %v3900_v3  ;;  %vm1315_vm10 = vcmask 531456  }
  0x97   : > { %v3747_v47 = vpack.i.bf16 %v952_v39, %v950_v40 }
  0x98   : > { %v781_v30 = vpop.permute.xlu1 %780  ;;  %v770_v31 = vpop.permute.xlu0 %769 }
  0x99   : > { %842 = vbcast.lane.b32.xlu1 %v4018_v21, 256  ;;  %831 = vbcast.lane.b32.xlu0 %v4022_v22, 256  ;;  %vm921_vm8 = vcmp.eq.s32.totalorder %v781_v30, %v3990_v2  ;;  %vm919_vm9 = vcmp.eq.s32.totalorder %v770_v31, %v3990_v2 }
  0x9c   : > { %v4102_v32 = vpop.permute.xlu1 %798  ;;  %v4104_v33 = vpop.permute.xlu0 %787 }
  0x9d   : > { %846 = vbcast.lane.b32.xlu1 %v4018_v21, 264  ;;  %835 = vbcast.lane.b32.xlu0 %v4022_v22, 264  ;;  %v953_v21 = vsel %vm921_vm8, 1.0, %v3900_v3  ;;  %v951_v22 = vsel %vm919_vm9, 1.0, %v3900_v3  ;;  %vm924_vm15 = vcmp.eq.s32.totalorder %v4102_v32, %v3990_v2  ;;  %vm922_vm0 = vcmp.eq.s32.totalorder %v4104_v33, %v3990_v2 }
  0x9e   : > { %v3752_v44 = vpack.i.bf16 %v953_v21, %v951_v22  ;;  %v956_v10 = vsel %vm924_vm15, 1.0, %v3900_v3  ;;  %v954_v13 = vsel %vm922_vm0, 1.0, %v3900_v3  ;;  %v884_v33 = vrot.slane %v4007_v18, %v4012_v19 }
  0x9f   : > { %v3757_v25 = vpack.i.bf16 %v956_v10, %v954_v13 }
  0xa0   : > { %v803_v36 = vpop.permute.xlu1 %802  ;;  %v792_v37 = vpop.permute.xlu0 %791 }
  0xa1   : > { %414 = vbcast.lane.b32.xlu1 %v412_v34, 256  ;;  %403 = vbcast.lane.b32.xlu0 %v401_v35, 256  ;;  %vm925_vm13 = vcmp.eq.s32.totalorder %v803_v36, %v3990_v2  ;;  %vm923_vm14 = vcmp.eq.s32.totalorder %v792_v37, %v3990_v2 }
  0xa2   : > { %v957_v8 = vsel %vm925_vm13, 1.0, %v3900_v3  ;;  %v955_v9 = vsel %vm923_vm14, 1.0, %v3900_v3 }
  0xa3   : > { %v3762_v16 = vpack.i.bf16 %v957_v8, %v955_v9  ;;  %v1200_v8 = vld [vmem:[%s4056_s25 + $0xe8] sm:$0xff]  ;;  %v1201_v9 = vld [vmem:[%s4056_s25 + $0xf0] sm:$0xff] }
  0xa4   : > { %v371_v42 = vpop.permute.xlu1 %370  ;;  %v360_v43 = vpop.permute.xlu0 %359 }
  0xa5   : > { %418 = vbcast.lane.b32.xlu1 %v412_v34, 264  ;;  %407 = vbcast.lane.b32.xlu0 %v401_v35, 264  ;;  %v539_v45 = vmul.f32 %v4121_v38, %v371_v42  ;;  %v537_v46 = vmul.f32 %v4121_v38, %v360_v43  ;;  %v873_v34 = vrot.slane %v4007_v18, %v4014_v20  ;;  %v4203_v43 = vld [vmem:[%s4030_s11 + $0x8] sm:$0xff] }
  0xa6   : > { %v467_v10 = vrot.slane %v4203_v43, %v4001_v12 }
  0xa7   : > { %v578_v48 = vadd.f32 %v4128_v41, %v539_v45  ;;  %v576_v49 = vadd.f32 %v4128_v41, %v537_v46  ;;  %v456_v46 = vrot.slane %v4203_v43, %v3995_v7 }
  0xa8   : > { %v375_v52 = vpop.permute.xlu1 %374  ;;  %v364_v53 = vpop.permute.xlu0 %363 }
  0xa9   : > { %3753 = vrot.lane.b32.xlu1 %v3752_v44, %s3901_s27  ;;  %3748 = vrot.lane.b32.xlu0 %v3747_v47, %s3901_s27  ;;  %v610_v54 = vmax.f32 %v578_v48, 0.0  ;;  %v608_v55 = vmax.f32 %v576_v49, 0.0  ;;  %v540_v56 = vmul.f32 %v4121_v38, %v375_v52  ;;  %v538_v57 = vmul.f32 %v4121_v38, %v364_v53 }
  0xaa   : > { %v445_v47 = vrot.slane %v4203_v43, %v3993_v4  ;;  %v895_v4 = vrot.slane %v4007_v18, %v4041_v29  ;;  %v906_v53 = vrot.slane %v4007_v18, %v4039_v28 }
  0xab   : > { %643 = vst.msk [vmem:[#allocation2 + $0x10] sm:$0xff] %vm640_vm12, %v610_v54  ;;  %641 = vst.msk [vmem:[#allocation2] sm:$0xff] %vm640_vm12, %v608_v55  ;;  %v579_v58 = vadd.f32 %v4128_v41, %v540_v56  ;;  %v577_v59 = vadd.f32 %v4128_v41, %v538_v57 }
  0xac   : > { %v4146_v60 = vpop.permute.xlu1 %820  ;;  %v4148_v61 = vpop.permute.xlu0 %809 }
  0xad   : > { %864 = vbcast.lane.b32.xlu1 %v862_v50, 256  ;;  %853 = vbcast.lane.b32.xlu0 %v851_v51, 256  ;;  %v611_v62 = vmax.f32 %v579_v58, 0.0  ;;  %v609_v63 = vmax.f32 %v577_v59, 0.0  ;;  %vm928_vm4 = vcmp.eq.s32.totalorder %v4146_v60, %v3990_v2  ;;  %vm926_vm6 = vcmp.eq.s32.totalorder %v4148_v61, %v3990_v2 }
  0xae   : > { %v960_v49 = vsel %vm928_vm4, 1.0, %v3900_v3 }
  0xaf   : > { %644 = vst.msk [vmem:[#allocation2 + $0x18] sm:$0xff] %vm640_vm12, %v611_v62  ;;  %642 = vst.msk [vmem:[#allocation2 + $0x8] sm:$0xff] %vm640_vm12, %v609_v63 }
  0xb0   : > { %v4156_v1 = vpop.permute.xlu1 %824  ;;  %v4158_v5 = vpop.permute.xlu0 %813 }
  0xb1   : > { %868 = vbcast.lane.b32.xlu1 %v862_v50, 264  ;;  %857 = vbcast.lane.b32.xlu0 %v851_v51, 264  ;;  %vm929_vm2 = vcmp.eq.s32.totalorder %v4156_v1, %v3990_v2  ;;  %vm927_vm3 = vcmp.eq.s32.totalorder %v4158_v5, %v3990_v2  ;;  %v958_v50 = vsel %vm926_vm6, 1.0, %v3900_v3 }
  0xb2   : > { %v961_v48 = vsel %vm929_vm2, 1.0, %v3900_v3  ;;  %v959_v7 = vsel %vm927_vm3, 1.0, %v3900_v3  ;;  %v3767_v52 = vpack.i.bf16 %v960_v49, %v958_v50  ;;  %v1204_v49 = vld [vmem:[%s4056_s25 + $0x108] sm:$0xff]  ;;  %v1205_v50 = vld [vmem:[%s4056_s25 + $0x110] sm:$0xff] }
  0xb3   : > { %v3772_v51 = vpack.i.bf16 %v961_v48, %v959_v7 }
  0xb4   : > { %v4170_v14 = vpop.permute.xlu1 %679  ;;  %v4172_v15 = vpop.permute.xlu0 %677 }
  0xb5   : > { %436 = vbcast.lane.b32.xlu1 %v434_v0, 256  ;;  %425 = vbcast.lane.b32.xlu0 %v423_v6, 256  ;;  %684 = vst.msk [vmem:[#allocation2] sm:$0xff] %vm683_vm1, %v4172_v15  ;;  %685 = vst.msk [vmem:[#allocation2 + $0x8] sm:$0xff] %vm683_vm1, %v4170_v14 }
  0xb6   : > { %686 = vst.msk [vmem:[#allocation2 + $0x10] sm:$0xff] %vm683_vm1, %v4172_v15  ;;  %687 = vst.msk [vmem:[#allocation2 + $0x18] sm:$0xff] %vm683_vm1, %v4170_v14 }
  0xb8   : > { %v393_v23 = vpop.permute.xlu1 %392  ;;  %v382_v24 = vpop.permute.xlu0 %381 }
  0xb9   : > { %3763 = vrot.lane.b32.xlu1 %v3762_v16, %s3901_s27  ;;  %3758 = vrot.lane.b32.xlu0 %v3757_v25, %s3901_s27  ;;  %v543_v26 = vmul.f32 %v4121_v38, %v393_v23  ;;  %v541_v30 = vmul.f32 %v4121_v38, %v382_v24 }
  0xbb   : > { %v582_v31 = vadd.f32 %v4128_v41, %v543_v26  ;;  %v580_v32 = vadd.f32 %v4128_v41, %v541_v30 }
  0xbc   : > { %v397_v35 = vpop.permute.xlu1 %396  ;;  %v386_v36 = vpop.permute.xlu0 %385 }
  0xbd   : > { %440 = vbcast.lane.b32.xlu1 %v434_v0, 264  ;;  %429 = vbcast.lane.b32.xlu0 %v423_v6, 264  ;;  %v614_v37 = vmax.f32 %v582_v31, 0.0  ;;  %v612_v21 = vmax.f32 %v580_v32, 0.0  ;;  %v544_v22 = vmul.f32 %v4121_v38, %v397_v35  ;;  %v542_v39 = vmul.f32 %v4121_v38, %v386_v36  ;;  %v1191_v0 = vld [vmem:[%s4056_s25 + $0xa0] sm:$0xff]  ;;  %v1192_v6 = vld [vmem:[%s4056_s25 + $0xa8] sm:$0xff] }
  0xbe   : > { %v3456_v31 = vpack.c.bf16 %v1192_v6, %v1191_v0  ;;  %v3472_v32 = vpack.c.bf16 %v1201_v9, %v1200_v8  ;;  %v1202_v36 = vld [vmem:[%s4056_s25 + $0xf8] sm:$0xff]  ;;  %v1207_v0 = vld [vmem:[%s4056_s25 + $0x120] sm:$0xff]  ;;  %v1208_v6 = vld [vmem:[%s4056_s25 + $0x128] sm:$0xff] }
  0xbf   : > { %647 = vst.msk [vmem:[#allocation2 + $0x30] sm:$0xff] %vm640_vm12, %v614_v37  ;;  %645 = vst.msk [vmem:[#allocation2 + $0x20] sm:$0xff] %vm640_vm12, %v612_v21  ;;  %v583_v40 = vadd.f32 %v4128_v41, %v544_v22  ;;  %v581_v42 = vadd.f32 %v4128_v41, %v542_v39  ;;  %v1203_v37 = vld [vmem:[%s4056_s25 + $0x100] sm:$0xff]  ;;  %v478_v39 = vrot.slane %v4203_v43, %v3999_v11  ;;  %v1216_v8 = vld [vmem:[%s4056_s25 + $0x168] sm:$0xff] }
  0xc0   : > { %690 = vst.msk [vmem:[#allocation2 + $0x30] sm:$0xff] %vm683_vm1, %v4172_v15  ;;  %688 = vst.msk [vmem:[#allocation2 + $0x20] sm:$0xff] %vm683_vm1, %v4172_v15  ;;  %v1217_v9 = vld [vmem:[%s4056_s25 + $0x170] sm:$0xff] }
  0xc1   : > { %886 = vbcast.lane.b32.xlu1 %v884_v33, 256  ;;  %875 = vbcast.lane.b32.xlu0 %v873_v34, 256  ;;  %v615_v44 = vmax.f32 %v583_v40, 0.0  ;;  %v613_v45 = vmax.f32 %v581_v42, 0.0 }
  0xc3   : > { %648 = vst.msk [vmem:[#allocation2 + $0x38] sm:$0xff] %vm640_vm12, %v615_v44  ;;  %646 = vst.msk [vmem:[#allocation2 + $0x28] sm:$0xff] %vm640_vm12, %v613_v45  ;;  %v3476_v45 = vpack.c.bf16 %v1203_v37, %v1202_v36 }
  0xc4   : > { %691 = vst.msk [vmem:[#allocation2 + $0x38] sm:$0xff] %vm683_vm1, %v4170_v14  ;;  %689 = vst.msk [vmem:[#allocation2 + $0x28] sm:$0xff] %vm683_vm1, %v4170_v14 }
  0xc5   : > { %890 = vbcast.lane.b32.xlu1 %v884_v33, 264  ;;  %879 = vbcast.lane.b32.xlu0 %v873_v34, 264  ;;  %v1193_v33 = vld [vmem:[%s4056_s25 + $0xb0] sm:$0xff]  ;;  %v1194_v34 = vld [vmem:[%s4056_s25 + $0xb8] sm:$0xff] }
  0xc6   : > { %v3460_v40 = vpack.c.bf16 %v1194_v34, %v1193_v33  ;;  %v1219_v33 = vld [vmem:[%s4056_s25 + $0x180] sm:$0xff] }
  0xc9   : > { %458 = vbcast.lane.b32.xlu1 %v456_v46, 256  ;;  %447 = vbcast.lane.b32.xlu0 %v445_v47, 256 }
  0xcd   : > { %3768 = vrot.lane.b32.xlu0 %v3767_v52, %s3901_s27  ;;  %3773 = vrot.lane.b32.xlu1 %v3772_v51, %s3901_s27 }
  0xd1   : > { %451 = vbcast.lane.b32.xlu0 %v445_v47, 264  ;;  %462 = vbcast.lane.b32.xlu1 %v456_v46, 264  ;;  %v1195_v46 = vld [vmem:[%s4056_s25 + $0xc0] sm:$0xff]  ;;  %v1196_v47 = vld [vmem:[%s4056_s25 + $0xc8] sm:$0xff] }
  0xd2   : > { %v3464_v52 = vpack.c.bf16 %v1196_v47, %v1195_v46  ;;  %v1211_v46 = vld [vmem:[%s4056_s25 + $0x140] sm:$0xff] }
  0xd5   : > { %897 = vbcast.lane.b32.xlu0 %v895_v4, 256  ;;  %908 = vbcast.lane.b32.xlu1 %v906_v53, 256 }
  0xd9   : > { %901 = vbcast.lane.b32.xlu0 %v895_v4, 264  ;;  %912 = vbcast.lane.b32.xlu1 %v906_v53, 264 }
 0x107   : > { %v3744_v54 = vpop.permute.xlu1 %3743  ;;  %v3739_v55 = vpop.permute.xlu0 %3738 }
 0x108   : > { %v3746_v56 = vunpack.i.h.bf16 %v3744_v54  ;;  %v3745_v57 = vunpack.i.l.bf16 %v3744_v54  ;;  %v3741_v58 = vunpack.i.h.bf16 %v3739_v55  ;;  %v3740_v59 = vunpack.i.l.bf16 %v3739_v55 }
 0x109   : > { %v3480_v54 = vpack.c.bf16 %v1205_v50, %v1204_v49  ;;  %v1221_v49 = vld [vmem:[%s4056_s25 + $0x190] sm:$0xff] }
 0x10a   : > { %1110 = vst.msk [vmem:[#allocation2 + $0x18] sm:$0xff] %vm1106_vm7, %v3746_v56  ;;  %1108 = vst.msk [vmem:[#allocation2 + $0x8] sm:$0xff] %vm1106_vm7, %v3745_v57 }
 0x10b   : > { %1109 = vst.msk [vmem:[#allocation2 + $0x10] sm:$0xff] %vm1106_vm7, %v3741_v58  ;;  %1107 = vst.msk [vmem:[#allocation2] sm:$0xff] %vm1106_vm7, %v3740_v59  ;;  %v843_v18 = vpop.permute.xlu1 %842  ;;  %v832_v60 = vpop.permute.xlu0 %831 }
 0x10c   : > { %vm932_vm8 = vcmp.eq.s32.totalorder %v843_v18, %v3990_v2  ;;  %vm930_vm9 = vcmp.eq.s32.totalorder %v832_v60, %v3990_v2 }
 0x10d   : > { %v964_v61 = vsel %vm932_vm8, 1.0, %v3900_v3  ;;  %v962_v62 = vsel %vm930_vm9, 1.0, %v3900_v3 }
 0x10e   : > { %v3777_v63 = vpack.i.bf16 %v964_v61, %v962_v62  ;;  %v1197_v62 = vld [vmem:[%s4056_s25 + $0xd0] sm:$0x1] }
 0x10f   : > { %v847_v1 = vpop.permute.xlu1 %846  ;;  %v836_v5 = vpop.permute.xlu0 %835 }
 0x110   : > { %vm933_vm11 = vcmp.eq.s32.totalorder %v847_v1, %v3990_v2  ;;  %vm931_vm13 = vcmp.eq.s32.totalorder %v836_v5, %v3990_v2  ;;  %3778 = vrot.lane.b32.xlu0 %v3777_v63, %s3901_s27  ;;  %v1206_v63 = vld [vmem:[%s4056_s25 + $0x118] sm:$0x1] }
 0x111   : > { %v965_v13 = vsel %vm933_vm11, 1.0, %v3900_v3  ;;  %v963_v16 = vsel %vm931_vm13, 1.0, %v3900_v3  ;;  %v1140_v24 = vld [vmem:[#allocation2 + $0x8] sm:$0xff]  ;;  %v1142_v30 = vld [vmem:[#allocation2 + $0x18] sm:$0xff] }
 0x112   : > { %v1139_v25 = vld [vmem:[#allocation2] sm:$0xff]  ;;  %v1141_v23 = vld [vmem:[#allocation2 + $0x10] sm:$0xff]  ;;  %v3782_v26 = vpack.i.bf16 %v965_v13, %v963_v16 }
 0x113   : > { %3102 = vmatprep.mubr.msk.f32.mxu0 %vm1315_vm10, %v1139_v25  ;;  %3123 = vmatprep.mubr.msk.f32.mxu1 %vm1315_vm10, %v1141_v23  ;;  %v415_v12 = vpop.permute.xlu1 %414  ;;  %v404_v35 = vpop.permute.xlu0 %403  ;;  %v3484_v25 = vpack.c.bf16 %v1208_v6, %v1207_v0  ;;  %v3500_v23 = vpack.c.bf16 %v1217_v9, %v1216_v8 }
 0x114   : > { %3103 = vmatmul.mubr.msk.f32.vlgmr.msra.gmra.mrb[0].mxu0 %vm1315_vm10, %v1140_v24  ;;  %3124 = vmatmul.mubr.msk.f32.vlgmr.msra.gmra.mrb[0].mxu1 %vm1315_vm10, %v1142_v30  ;;  %v547_v21 = vmul.f32 %v4121_v38, %v415_v12  ;;  %v545_v22 = vmul.f32 %v4121_v38, %v404_v35  ;;  %v1209_v30 = vld [vmem:[%s4056_s25 + $0x130] sm:$0xff] }
 0x115   : > { %469 = vbcast.lane.b32.xlu0 %v467_v10, 256  ;;  %3783 = vrot.lane.b32.xlu1 %v3782_v26, %s3901_s27 }
 0x116   : > { %3455 = vmatpush3.bf16.msra.mxu0 %v4091_v17  ;;  %3471 = vmatpush3.bf16.msra.mxu1 %v4094_v27  ;;  %v586_v42 = vadd.f32 %v4128_v41, %v547_v21  ;;  %v584_v44 = vadd.f32 %v4128_v41, %v545_v22 }
 0x117   : > { %3457 = vmatprep.subr.bf16.mxu0 %v3456_v31  ;;  %3473 = vmatprep.subr.bf16.mxu1 %v3472_v32  ;;  %v419_v48 = vpop.permute.xlu1 %418  ;;  %v408_v7 = vpop.permute.xlu0 %407 }
 0x118   : > { %v618_v51 = vmax.f32 %v586_v42, 0.0  ;;  %v616_v11 = vmax.f32 %v584_v44, 0.0  ;;  %v548_v17 = vmul.f32 %v4121_v38, %v419_v48  ;;  %v546_v27 = vmul.f32 %v4121_v38, %v408_v7  ;;  %v1212_v7 = vld [vmem:[%s4056_s25 + $0x148] sm:$0xff] }
 0x119   : > { %473 = vbcast.lane.b32.xlu0 %v467_v10, 264  ;;  %480 = vbcast.lane.b32.xlu1 %v478_v39, 256 }
 0x11a   : > { %3459 = vmatpush3.bf16.msra.mxu0 %v3456_v31  ;;  %3475 = vmatpush3.bf16.msra.mxu1 %v3472_v32  ;;  %651 = vst.msk [vmem:[#allocation2 + $0x50] sm:$0xff] %vm640_vm12, %v618_v51  ;;  %649 = vst.msk [vmem:[#allocation2 + $0x40] sm:$0xff] %vm640_vm12, %v616_v11  ;;  %v587_v4 = vadd.f32 %v4128_v41, %v548_v17  ;;  %v585_v53 = vadd.f32 %v4128_v41, %v546_v27  ;;  %v1210_v31 = vld [vmem:[%s4056_s25 + $0x138] sm:$0xff] }
 0x11b   : > { %3461 = vmatprep.subr.bf16.mxu0 %v3460_v40  ;;  %3477 = vmatprep.subr.bf16.mxu1 %v3476_v45  ;;  %694 = vst.msk [vmem:[#allocation2 + $0x50] sm:$0xff] %vm683_vm1, %v4172_v15  ;;  %692 = vst.msk [vmem:[#allocation2 + $0x40] sm:$0xff] %vm683_vm1, %v4172_v15  ;;  %v3754_v55 = vpop.permute.xlu1 %3753  ;;  %v3749_v56 = vpop.permute.xlu0 %3748  ;;  %v1218_v32 = vld [vmem:[%s4056_s25 + $0x178] sm:$0xff]  ;;  %v3488_v44 = vpack.c.bf16 %v1210_v31, %v1209_v30  ;;  %v500_v11 = vrot.slane %v4203_v43, %v4012_v19  ;;  %v1235_v31 = vld [vmem:[%s4056_s25 + $0x200] sm:$0xff] }
 0x11c   : > { %v619_v57 = vmax.f32 %v587_v4, 0.0  ;;  %v617_v58 = vmax.f32 %v585_v53, 0.0  ;;  %v3756_v59 = vunpack.i.h.bf16 %v3754_v55  ;;  %v3755_v18 = vunpack.i.l.bf16 %v3754_v55  ;;  %v1213_v53 = vld [vmem:[%s4056_s25 + $0x150] sm:$0xff]  ;;  %v1234_v30 = vld [vmem:[%s4056_s25 + $0x1f8] sm:$0xff] }
 0x11d   : > { %484 = vbcast.lane.b32.xlu1 %v478_v39, 264  ;;  %v3751_v60 = vunpack.i.h.bf16 %v3749_v56  ;;  %v3750_v61 = vunpack.i.l.bf16 %v3749_v56  ;;  %v489_v39 = vrot.slane %v4203_v43, %v4014_v20  ;;  %v1220_v20 = vld [vmem:[%s4056_s25 + $0x188] sm:$0xff] }
 0x11e   : > { %3463 = vmatpush3.bf16.msra.mxu0 %v3460_v40  ;;  %3479 = vmatpush3.bf16.msra.mxu1 %v3476_v45  ;;  %652 = vst.msk [vmem:[#allocation2 + $0x58] sm:$0xff] %vm640_vm12, %v619_v57  ;;  %650 = vst.msk [vmem:[#allocation2 + $0x48] sm:$0xff] %vm640_vm12, %v617_v58  ;;  %v3504_v45 = vpack.c.bf16 %v1219_v33, %v1218_v32  ;;  %v3508_v4 = vpack.c.bf16 %v1221_v49, %v1220_v20 }
 0x11f   : > { %1114 = vst.msk [vmem:[#allocation2 + $0x38] sm:$0xff] %vm1106_vm7, %v3756_v59  ;;  %1112 = vst.msk [vmem:[#allocation2 + $0x28] sm:$0xff] %vm1106_vm7, %v3755_v18  ;;  %3465 = vmatprep.subr.bf16.mxu0 %v3464_v52  ;;  %3481 = vmatprep.subr.bf16.mxu1 %v3480_v54  ;;  %v865_v1 = vpop.permute.xlu1 %864  ;;  %v854_v5 = vpop.permute.xlu0 %853  ;;  %v1222_v59 = vld [vmem:[%s4056_s25 + $0x198] sm:$0xff]  ;;  %v1223_v18 = vld [vmem:[%s4056_s25 + $0x1a0] sm:$0xff] }
 0x120   : > { %695 = vst.msk [vmem:[#allocation2 + $0x58] sm:$0xff] %vm683_vm1, %v4170_v14  ;;  %693 = vst.msk [vmem:[#allocation2 + $0x48] sm:$0xff] %vm683_vm1, %v4170_v14  ;;  %vm936_vm14 = vcmp.eq.s32.totalorder %v865_v1, %v3990_v2  ;;  %vm934_vm15 = vcmp.eq.s32.totalorder %v854_v5, %v3990_v2  ;;  %v3512_v0 = vpack.c.bf16 %v1223_v18, %v1222_v59  ;;  %v1231_v59 = vld [vmem:[%s4056_s25 + $0x1e0] sm:$0xff]  ;;  %v1232_v18 = vld [vmem:[%s4056_s25 + $0x1e8] sm:$0xff] }
 0x121   : > { %1113 = vst.msk [vmem:[#allocation2 + $0x30] sm:$0xff] %vm1106_vm7, %v3751_v60  ;;  %1111 = vst.msk [vmem:[#allocation2 + $0x20] sm:$0xff] %vm1106_vm7, %v3750_v61  ;;  %v968_v10 = vsel %vm936_vm14, 1.0, %v3900_v3  ;;  %v966_v13 = vsel %vm934_vm15, 1.0, %v3900_v3 }
 0x122   : > { %3467 = vmatpush3.bf16.msra.mxu0 %v3464_v52  ;;  %3483 = vmatpush3.bf16.msra.mxu1 %v3480_v54  ;;  %v3787_v16 = vpack.i.bf16 %v968_v10, %v966_v13  ;;  %v3492_v52 = vpack.c.bf16 %v1212_v7, %v1211_v46  ;;  %v1214_v54 = vld [vmem:[%s4056_s25 + $0x158] sm:$0xff]  ;;  %v1215_v13 = vld [vmem:[%s4056_s25 + $0x160] sm:$0x1]  ;;  %v511_v7 = vrot.slane %v4203_v43, %v4041_v29 }
 0x123   : > { %3142 = vmatprep.subr.msk.mxu0 %vm1322_vm5, %v1197_v62  ;;  %3163 = vmatprep.subr.msk.mxu1 %vm1322_vm5, %v1206_v63  ;;  %v869_v24 = vpop.permute.xlu1 %868  ;;  %v858_v26 = vpop.permute.xlu0 %857  ;;  %v3496_v19 = vpack.c.bf16 %v1214_v54, %v1213_v53  ;;  %v522_v54 = vrot.slane %v4203_v43, %v4039_v28 }
 0x124   : > { %vm937_vm0 = vcmp.eq.s32.totalorder %v869_v24, %v3990_v2  ;;  %vm935_vm2 = vcmp.eq.s32.totalorder %v858_v26, %v3990_v2  ;;  %3788 = vrot.lane.b32.xlu0 %v3787_v16, %s3901_s27  ;;  %v1224_v16 = vld [vmem:[%s4056_s25 + $0x1a8] sm:$0x1]  ;;  %v1226_v26 = vld [vmem:[%s4056_s25 + $0x1b8] sm:$0xff] }
 0x125   : > { %v969_v34 = vsel %vm937_vm0, 1.0, %v3900_v3  ;;  %v967_v12 = vsel %vm935_vm2, 1.0, %v3900_v3 }
 0x126   : > { %3143 = vmatpush3.msk.msra.mxu0 %vm1322_vm5, %v1197_v62  ;;  %3164 = vmatpush3.msk.msra.mxu1 %vm1322_vm5, %v1206_v63  ;;  %v1144_v35 = vld [vmem:[#allocation2 + $0x28] sm:$0xff]  ;;  %v1146_v36 = vld [vmem:[#allocation2 + $0x38] sm:$0xff]  ;;  %v3792_v37 = vpack.i.bf16 %v969_v34, %v967_v12 }
 0x127   : > { %3485 = vmatprep.subr.bf16.mxu0 %v3484_v25  ;;  %3501 = vmatprep.subr.bf16.mxu1 %v3500_v23  ;;  %v437_v40 = vpop.permute.xlu1 %436  ;;  %v426_v42 = vpop.permute.xlu0 %425 }
 0x128   : > { %v1143_v21 = vld [vmem:[#allocation2 + $0x20] sm:$0xff]  ;;  %v1145_v22 = vld [vmem:[#allocation2 + $0x30] sm:$0xff]  ;;  %v551_v47 = vmul.f32 %v4121_v38, %v437_v40  ;;  %v549_v48 = vmul.f32 %v4121_v38, %v426_v42  ;;  %491 = vbcast.lane.b32.xlu0 %v489_v39, 256  ;;  %3793 = vrot.lane.b32.xlu1 %v3792_v37, %s3901_s27  ;;  %v1228_v40 = vld [vmem:[%s4056_s25 + $0x1c8] sm:$0xff] }
 0x129   : > { %3144 = vmatprep.mubr.msk.f32.mxu0 %vm1315_vm10, %v1143_v21  ;;  %3165 = vmatprep.mubr.msk.f32.mxu1 %vm1315_vm10, %v1145_v22  ;;  %v1236_v42 = vld [vmem:[%s4056_s25 + $0x208] sm:$0xff] }
 0x12a   : > { %3145 = vmatmul.mubr.msk.f32.vlgmr.msra.gmra.mrb[2].mxu0 %vm1315_vm10, %v1144_v35  ;;  %3166 = vmatmul.mubr.msk.f32.vlgmr.msra.gmra.mrb[2].mxu1 %vm1315_vm10, %v1146_v36  ;;  %v590_v50 = vadd.f32 %v4128_v41, %v551_v47  ;;  %v588_v51 = vadd.f32 %v4128_v41, %v549_v48  ;;  %v1227_v36 = vld [vmem:[%s4056_s25 + $0x1c0] sm:$0xff] }
 0x12b   : > { %3487 = vmatpush3.bf16.msra.mxu0 %v3484_v25  ;;  %3503 = vmatpush3.bf16.msra.mxu1 %v3500_v23  ;;  %v3764_v17 = vpop.permute.xlu1 %3763  ;;  %v3759_v27 = vpop.permute.xlu0 %3758  ;;  %v1225_v25 = vld [vmem:[%s4056_s25 + $0x1b0] sm:$0xff]  ;;  %v3520_v49 = vpack.c.bf16 %v1228_v40, %v1227_v36  ;;  %v1246_v36 = vld [vmem:[%s4056_s25 + $0x258] sm:$0xff]  ;;  %v1255_v40 = vld [vmem:[%s4056_s25 + $0x2a0] sm:$0xff] }
 0x12c   : > { %3489 = vmatprep.subr.bf16.mxu0 %v3488_v44  ;;  %3505 = vmatprep.subr.bf16.mxu1 %v3504_v45  ;;  %v622_v55 = vmax.f32 %v590_v50, 0.0  ;;  %v620_v56 = vmax.f32 %v588_v51, 0.0  ;;  %v3766_v57 = vunpack.i.h.bf16 %v3764_v17  ;;  %v3765_v58 = vunpack.i.l.bf16 %v3764_v17  ;;  %v1229_v51 = vld [vmem:[%s4056_s25 + $0x1d0] sm:$0xff] }
 0x12d   : > { %v3761_v60 = vunpack.i.h.bf16 %v3759_v27  ;;  %v3760_v61 = vunpack.i.l.bf16 %v3759_v27  ;;  %495 = vbcast.lane.b32.xlu0 %v489_v39, 264  ;;  %502 = vbcast.lane.b32.xlu1 %v500_v11, 256  ;;  %v3516_v22 = vpack.c.bf16 %v1226_v26, %v1225_v25  ;;  %v3532_v39 = vpack.c.bf16 %v1235_v31, %v1234_v30  ;;  %v1242_v26 = vld [vmem:[%s4056_s25 + $0x238] sm:$0x1] }
 0x12e   : > { %655 = vst.msk [vmem:[#allocation2 + $0x70] sm:$0xff] %vm640_vm12, %v622_v55  ;;  %653 = vst.msk [vmem:[#allocation2 + $0x60] sm:$0xff] %vm640_vm12, %v620_v56 }
 0x12f   : > { %3491 = vmatpush3.bf16.msra.mxu0 %v3488_v44  ;;  %3507 = vmatpush3.bf16.msra.mxu1 %v3504_v45  ;;  %1118 = vst.msk [vmem:[#allocation2 + $0x58] sm:$0xff] %vm1106_vm7, %v3766_v57  ;;  %1116 = vst.msk [vmem:[#allocation2 + $0x48] sm:$0xff] %vm1106_vm7, %v3765_v58  ;;  %v441_v62 = vpop.permute.xlu1 %440  ;;  %v430_v63 = vpop.permute.xlu0 %429  ;;  %v1237_v44 = vld [vmem:[%s4056_s25 + $0x210] sm:$0xff] }
 0x130   : > { %698 = vst.msk [vmem:[#allocation2 + $0x70] sm:$0xff] %vm683_vm1, %v4172_v15  ;;  %696 = vst.msk [vmem:[#allocation2 + $0x60] sm:$0xff] %vm683_vm1, %v4172_v15  ;;  %3493 = vmatprep.subr.bf16.mxu0 %v3492_v52  ;;  %3509 = vmatprep.subr.bf16.mxu1 %v3508_v4  ;;  %v552_v1 = vmul.f32 %v4121_v38, %v441_v62  ;;  %v550_v5 = vmul.f32 %v4121_v38, %v430_v63  ;;  %v1241_v62 = vld [vmem:[%s4056_s25 + $0x230] sm:$0xff] }
 0x131   : > { %1117 = vst.msk [vmem:[#allocation2 + $0x50] sm:$0xff] %vm1106_vm7, %v3761_v60  ;;  %1115 = vst.msk [vmem:[#allocation2 + $0x40] sm:$0xff] %vm1106_vm7, %v3760_v61  ;;  %506 = vbcast.lane.b32.xlu1 %v500_v11, 264  ;;  %v3536_v50 = vpack.c.bf16 %v1237_v44, %v1236_v42  ;;  %v1230_v11 = vld [vmem:[%s4056_s25 + $0x1d8] sm:$0xff] }
 0x132   : > { %v591_v6 = vadd.f32 %v4128_v41, %v552_v1  ;;  %v589_v8 = vadd.f32 %v4128_v41, %v550_v5  ;;  %v3524_v55 = vpack.c.bf16 %v1230_v11, %v1229_v51 }
 0x133   : > { %3495 = vmatpush3.bf16.msra.mxu0 %v3492_v52  ;;  %3511 = vmatpush3.bf16.msra.mxu1 %v3508_v4  ;;  %v887_v9 = vpop.permute.xlu1 %886  ;;  %v876_v10 = vpop.permute.xlu0 %875  ;;  %v1238_v52 = vld [vmem:[%s4056_s25 + $0x218] sm:$0xff]  ;;  %v1239_v4 = vld [vmem:[%s4056_s25 + $0x220] sm:$0xff] }
 0x134   : > { %3497 = vmatprep.subr.bf16.mxu0 %v3496_v19  ;;  %3513 = vmatprep.subr.bf16.mxu1 %v3512_v0  ;;  %v623_v23 = vmax.f32 %v591_v6, 0.0  ;;  %v621_v24 = vmax.f32 %v589_v8, 0.0  ;;  %vm940_vm3 = vcmp.eq.s32.totalorder %v887_v9, %v3990_v2  ;;  %vm938_vm4 = vcmp.eq.s32.totalorder %v876_v10, %v3990_v2 }
 0x135   : > { %v972_v32 = vsel %vm940_vm3, 1.0, %v3900_v3  ;;  %v970_v33 = vsel %vm938_vm4, 1.0, %v3900_v3  ;;  %v3540_v58 = vpack.c.bf16 %v1239_v4, %v1238_v52  ;;  %v3528_v6 = vpack.c.bf16 %v1232_v18, %v1231_v59  ;;  %v1257_v4 = vld [vmem:[%s4056_s25 + $0x2b0] sm:$0xff]  ;;  %v1251_v59 = vld [vmem:[%s4056_s25 + $0x280] sm:$0x1] }
 0x136   : > { %656 = vst.msk [vmem:[#allocation2 + $0x78] sm:$0xff] %vm640_vm12, %v623_v23  ;;  %654 = vst.msk [vmem:[#allocation2 + $0x68] sm:$0xff] %vm640_vm12, %v621_v24  ;;  %v3797_v34 = vpack.i.bf16 %v972_v32, %v970_v33  ;;  %v1148_v47 = vld [vmem:[#allocation2 + $0x48] sm:$0xff]  ;;  %v1150_v48 = vld [vmem:[#allocation2 + $0x58] sm:$0xff] }
 0x137   : > { %3499 = vmatpush3.bf16.msra.mxu0 %v3496_v19  ;;  %3515 = vmatpush3.bf16.msra.mxu1 %v3512_v0  ;;  %699 = vst.msk [vmem:[#allocation2 + $0x78] sm:$0xff] %vm683_vm1, %v4170_v14  ;;  %697 = vst.msk [vmem:[#allocation2 + $0x68] sm:$0xff] %vm683_vm1, %v4170_v14  ;;  %v891_v37 = vpop.permute.xlu1 %890  ;;  %v880_v21 = vpop.permute.xlu0 %879  ;;  %v1240_v19 = vld [vmem:[%s4056_s25 + $0x228] sm:$0xff]  ;;  %v1233_v24 = vld [vmem:[%s4056_s25 + $0x1f0] sm:$0x1] }
 0x138   : > { %3184 = vmatprep.subr.msk.mxu0 %vm1322_vm5, %v1215_v13  ;;  %v1147_v12 = vld [vmem:[#allocation2 + $0x40] sm:$0xff]  ;;  %3205 = vmatprep.subr.msk.mxu1 %vm1322_vm5, %v1224_v16  ;;  %v1149_v35 = vld [vmem:[#allocation2 + $0x50] sm:$0xff]  ;;  %vm941_vm6 = vcmp.eq.s32.totalorder %v891_v37, %v3990_v2  ;;  %vm939_vm8 = vcmp.eq.s32.totalorder %v880_v21, %v3990_v2  ;;  %v3544_v8 = vpack.c.bf16 %v1241_v62, %v1240_v19  ;;  %v1244_v33 = vld [vmem:[%s4056_s25 + $0x248] sm:$0xff] }
 0x139   : > { %3186 = vmatprep.mubr.msk.f32.mxu0 %vm1315_vm10, %v1147_v12  ;;  %3207 = vmatprep.mubr.msk.f32.mxu1 %vm1315_vm10, %v1149_v35  ;;  %v973_v45 = vsel %vm941_vm6, 1.0, %v3900_v3  ;;  %v971_v46 = vsel %vm939_vm8, 1.0, %v3900_v3  ;;  %v1243_v32 = vld [vmem:[%s4056_s25 + $0x240] sm:$0xff]  ;;  %v1245_v35 = vld [vmem:[%s4056_s25 + $0x250] sm:$0xff]  ;;  %v1270_v19 = vld [vmem:[%s4056_s25 + $0x318] sm:$0xff] }
 0x13a   : > { %3798 = vrot.lane.b32.xlu0 %v3797_v34, %s3901_s27  ;;  %v3802_v20 = vpack.i.bf16 %v973_v45, %v971_v46  ;;  %v1252_v34 = vld [vmem:[%s4056_s25 + $0x288] sm:$0xff]  ;;  %v3552_v51 = vpack.c.bf16 %v1246_v36, %v1245_v35  ;;  %v1261_v18 = vld [vmem:[%s4056_s25 + $0x2d0] sm:$0xff]  ;;  %v1271_v62 = vld [vmem:[%s4056_s25 + $0x320] sm:$0xff] }
 0x13b   : > { %3185 = vmatpush3.msk.msra.mxu0 %vm1322_vm5, %v1215_v13  ;;  %3206 = vmatpush3.msk.msra.mxu1 %vm1322_vm5, %v1224_v16  ;;  %v459_v17 = vpop.permute.xlu1 %458  ;;  %v448_v27 = vpop.permute.xlu0 %447 }
 0x13c   : > { %3187 = vmatmul.mubr.msk.f32.vlgmr.msra.gmra.mrb[4].mxu0 %vm1315_vm10, %v1148_v47  ;;  %3208 = vmatmul.mubr.msk.f32.vlgmr.msra.gmra.mrb[4].mxu1 %vm1315_vm10, %v1150_v48  ;;  %v555_v29 = vmul.f32 %v4121_v38, %v459_v17  ;;  %v553_v53 = vmul.f32 %v4121_v38, %v448_v27  ;;  %v3548_v47 = vpack.c.bf16 %v1244_v33, %v1243_v32  ;;  %v1247_v17 = vld [vmem:[%s4056_s25 + $0x260] sm:$0xff]  ;;  %v1248_v27 = vld [vmem:[%s4056_s25 + $0x268] sm:$0xff] }
 0x13d   : > { %3517 = vmatprep.subr.bf16.mxu0 %v3516_v22  ;;  %3533 = vmatprep.subr.bf16.mxu1 %v3532_v39  ;;  %v1263_v32 = vld [vmem:[%s4056_s25 + $0x2e0] sm:$0xff]  ;;  %v1264_v33 = vld [vmem:[%s4056_s25 + $0x2e8] sm:$0xff] }
 0x13e   : > { %3519 = vmatpush3.bf16.msra.mxu0 %v3516_v22  ;;  %3535 = vmatpush3.bf16.msra.mxu1 %v3532_v39  ;;  %v594_v56 = vadd.f32 %v4128_v41, %v555_v29  ;;  %v592_v57 = vadd.f32 %v4128_v41, %v553_v53  ;;  %v1254_v39 = vld [vmem:[%s4056_s25 + $0x298] sm:$0xff]  ;;  %v1249_v53 = vld [vmem:[%s4056_s25 + $0x270] sm:$0xff] }
 0x13f   : > { %513 = vbcast.lane.b32.xlu0 %v511_v7, 256  ;;  %3803 = vrot.lane.b32.xlu1 %v3802_v20, %s3901_s27  ;;  %v3774_v60 = vpop.permute.xlu1 %3773  ;;  %v3769_v61 = vpop.permute.xlu0 %3768  ;;  %v3568_v11 = vpack.c.bf16 %v1255_v40, %v1254_v39 }
 0x140   : > { %3521 = vmatprep.subr.bf16.mxu0 %v3520_v49  ;;  %3537 = vmatprep.subr.bf16.mxu1 %v3536_v50  ;;  %v626_v63 = vmax.f32 %v594_v56, 0.0  ;;  %v624_v0 = vmax.f32 %v592_v57, 0.0  ;;  %v3776_v1 = vunpack.i.h.bf16 %v3774_v60  ;;  %v3775_v28 = vunpack.i.l.bf16 %v3774_v60  ;;  %v1259_v56 = vld [vmem:[%s4056_s25 + $0x2c0] sm:$0xff]  ;;  %v1262_v60 = vld [vmem:[%s4056_s25 + $0x2d8] sm:$0xff] }
 0x141   : > { %v3771_v43 = vunpack.i.h.bf16 %v3769_v61  ;;  %v3770_v5 = vunpack.i.l.bf16 %v3769_v61  ;;  %v1260_v61 = vld [vmem:[%s4056_s25 + $0x2c8] sm:$0x1] }
 0x142   : > { %3523 = vmatpush3.bf16.msra.mxu0 %v3520_v49  ;;  %3539 = vmatpush3.bf16.msra.mxu1 %v3536_v50  ;;  %659 = vst.msk [vmem:[#allocation2 + $0x90] sm:$0xff] %vm640_vm12, %v626_v63  ;;  %657 = vst.msk [vmem:[#allocation2 + $0x80] sm:$0xff] %vm640_vm12, %v624_v0  ;;  %v3580_v63 = vpack.c.bf16 %v1262_v60, %v1261_v18  ;;  %v3596_v0 = vpack.c.bf16 %v1271_v62, %v1270_v19  ;;  %v1288_v18 = vld [vmem:[%s4056_s25 + $0x3a8] sm:$0xff]  ;;  %v1289_v60 = vld [vmem:[%s4056_s25 + $0x3b0] sm:$0xff] }
 0x143   : > { %517 = vbcast.lane.b32.xlu0 %v511_v7, 264  ;;  %524 = vbcast.lane.b32.xlu1 %v522_v54, 256  ;;  %1122 = vst.msk [vmem:[#allocation2 + $0x78] sm:$0xff] %vm1106_vm7, %v3776_v1  ;;  %1120 = vst.msk [vmem:[#allocation2 + $0x68] sm:$0xff] %vm1106_vm7, %v3775_v28  ;;  %v463_v9 = vpop.permute.xlu1 %462  ;;  %v452_v10 = vpop.permute.xlu0 %451 }
 0x144   : > { %3525 = vmatprep.subr.bf16.mxu0 %v3524_v55  ;;  %3541 = vmatprep.subr.bf16.mxu1 %v3540_v58  ;;  %702 = vst.msk [vmem:[#allocation2 + $0x90] sm:$0xff] %vm683_vm1, %v4172_v15  ;;  %700 = vst.msk [vmem:[#allocation2 + $0x80] sm:$0xff] %vm683_vm1, %v4172_v15  ;;  %v556_v13 = vmul.f32 %v4121_v38, %v463_v9  ;;  %v554_v16 = vmul.f32 %v4121_v38, %v452_v10  ;;  %v4472_v10 = vld [vmem:[%s4760_s3] ss:$0 sm:$0xff] }
 0x145   : > { %1121 = vst.msk [vmem:[#allocation2 + $0x70] sm:$0xff] %vm1106_vm7, %v3771_v43  ;;  %1119 = vst.msk [vmem:[#allocation2 + $0x60] sm:$0xff] %vm1106_vm7, %v3770_v5 }
 0x146   : > { %3527 = vmatpush3.bf16.msra.mxu0 %v3524_v55  ;;  %3543 = vmatpush3.bf16.msra.mxu1 %v3540_v58  ;;  %v595_v25 = vadd.f32 %v4128_v41, %v556_v13  ;;  %v593_v23 = vadd.f32 %v4128_v41, %v554_v16  ;;  %v1253_v41 = vld [vmem:[%s4056_s25 + $0x290] sm:$0xff]  ;;  %v1258_v55 = vld [vmem:[%s4056_s25 + $0x2b8] sm:$0xff]  ;;  %v4480_v16 = vld [vmem:[%s4761_s4] ss:$0 sm:$0xff] }
 0x147   : > { %528 = vbcast.lane.b32.xlu1 %v522_v54, 264  ;;  %3529 = vmatprep.subr.bf16.mxu0 %v3528_v6  ;;  %v909_v30 = vpop.permute.xlu1 %908  ;;  %v898_v31 = vpop.permute.xlu0 %897  ;;  %v3564_v20 = vpack.c.bf16 %v1253_v41, %v1252_v34  ;;  %v1250_v54 = vld [vmem:[%s4056_s25 + $0x278] sm:$0xff]  ;;  %v3576_v58 = vpack.c.bf16 %v1259_v56, %v1258_v55  ;;  %v1272_v34 = vld [vmem:[%s4056_s25 + $0x328] sm:$0xff]  ;;  %v1273_v41 = vld [vmem:[%s4056_s25 + $0x330] sm:$0xff] }
 0x148   : > { %3545 = vmatprep.subr.bf16.mxu1 %v3544_v8  ;;  %v627_v38 = vmax.f32 %v595_v25, 0.0  ;;  %v625_v12 = vmax.f32 %v593_v23, 0.0  ;;  %vm944_vm9 = vcmp.eq.s32.totalorder %v909_v30, %v3990_v2  ;;  %vm942_vm11 = vcmp.eq.s32.totalorder %v898_v31, %v3990_v2  ;;  %v1278_v55 = vld [vmem:[%s4056_s25 + $0x358] sm:$0x1]  ;;  %v1279_v56 = vld [vmem:[%s4056_s25 + $0x360] sm:$0xff] }
 0x149   : > { %v976_v37 = vsel %vm944_vm9, 1.0, %v3900_v3  ;;  %v974_v21 = vsel %vm942_vm11, 1.0, %v3900_v3  ;;  %v3560_v57 = vpack.c.bf16 %v1250_v54, %v1249_v53  ;;  %v1269_v54 = vld [vmem:[%s4056_s25 + $0x310] sm:$0x1] }
 0x14a   : > { %3531 = vmatpush3.bf16.msra.mxu0 %v3528_v6  ;;  %3547 = vmatpush3.bf16.msra.mxu1 %v3544_v8  ;;  %v1152_v22 = vld [vmem:[#allocation2 + $0x68] sm:$0xff]  ;;  %660 = vst.msk [vmem:[#allocation2 + $0x98] sm:$0xff] %vm640_vm12, %v627_v38  ;;  %658 = vst.msk [vmem:[#allocation2 + $0x88] sm:$0xff] %vm640_vm12, %v625_v12  ;;  %v3807_v42 = vpack.i.bf16 %v976_v37, %v974_v21  ;;  %v1154_v46 = vld [vmem:[#allocation2 + $0x78] sm:$0xff]  ;;  %v3584_v21 = vpack.c.bf16 %v1264_v33, %v1263_v32 }
 0x14b   : > { %3226 = vmatprep.subr.msk.mxu0 %vm1322_vm5, %v1233_v24  ;;  %3247 = vmatprep.subr.msk.mxu1 %vm1322_vm5, %v1242_v26  ;;  %703 = vst.msk [vmem:[#allocation2 + $0x98] sm:$0xff] %vm683_vm1, %v4170_v14  ;;  %701 = vst.msk [vmem:[#allocation2 + $0x88] sm:$0xff] %vm683_vm1, %v4170_v14  ;;  %v913_v48 = vpop.permute.xlu1 %912  ;;  %v902_v7 = vpop.permute.xlu0 %901 }
 0x14c   : > { %v1151_v44 = vld [vmem:[#allocation2 + $0x60] sm:$0xff]  ;;  %v1153_v45 = vld [vmem:[#allocation2 + $0x70] sm:$0xff]  ;;  %vm945_vm13 = vcmp.eq.s32.totalorder %v913_v48, %v3990_v2  ;;  %vm943_vm14 = vcmp.eq.s32.totalorder %v902_v7, %v3990_v2  ;;  %3808 = vrot.lane.b32.xlu0 %v3807_v42, %s3901_s27  ;;  %v1256_v2 = vld [vmem:[%s4056_s25 + $0x2a8] sm:$0xff]  ;;  %v3600_v42 = vpack.c.bf16 %v1273_v41, %v1272_v34 }
 0x14d   : > { %3228 = vmatprep.mubr.msk.f32.mxu0 %vm1315_vm10, %v1151_v44  ;;  %3249 = vmatprep.mubr.msk.f32.mxu1 %vm1315_vm10, %v1153_v45  ;;  %v977_v49 = vsel %vm945_vm13, 1.0, %v3900_v3  ;;  %v975_v50 = vsel %vm943_vm14, 1.0, %v3900_v3  ;;  %v3556_v3 = vpack.c.bf16 %v1248_v27, %v1247_v17  ;;  %v3572_v29 = vpack.c.bf16 %v1257_v4, %v1256_v2  ;;  %v1265_v44 = vld [vmem:[%s4056_s25 + $0x2f0] sm:$0xff]  ;;  %v1266_v45 = vld [vmem:[%s4056_s25 + $0x2f8] sm:$0xff]  ;;  %v1275_v7 = vld [vmem:[%s4056_s25 + $0x340] sm:$0xff] }
 0x14e   : > { %3227 = vmatpush3.msk.msra.mxu0 %vm1322_vm5, %v1233_v24  ;;  %3248 = vmatpush3.msk.msra.mxu1 %vm1322_vm5, %v1242_v26  ;;  %v3812_v52 = vpack.i.bf16 %v977_v49, %v975_v50  ;;  %v3588_v50 = vpack.c.bf16 %v1266_v45, %v1265_v44  ;;  %v1268_v17 = vld [vmem:[%s4056_s25 + $0x308] sm:$0xff] }
 0x14f   : > { %3229 = vmatmul.mubr.msk.f32.vlgmr.msra.gmra.mrb[6].mxu0 %vm1315_vm10, %v1152_v22  ;;  %3250 = vmatmul.mubr.msk.f32.vlgmr.msra.gmra.mrb[6].mxu1 %vm1315_vm10, %v1154_v46  ;;  %v1274_v46 = vld [vmem:[%s4056_s25 + $0x338] sm:$0xff]  ;;  %v1276_v27 = vld [vmem:[%s4056_s25 + $0x348] sm:$0xff] }
 0x150   : > { %3549 = vmatprep.subr.bf16.mxu0 %v3548_v47  ;;  %3565 = vmatprep.subr.bf16.mxu1 %v3564_v20 }
 0x151   : > { %3551 = vmatpush3.bf16.msra.mxu0 %v3548_v47  ;;  %3813 = vrot.lane.b32.xlu1 %v3812_v52, %s3901_s27  ;;  %v1277_v52 = vld [vmem:[%s4056_s25 + $0x350] sm:$0xff] }
 0x152   : > { %3567 = vmatpush3.bf16.msra.mxu1 %v3564_v20  ;;  %3553 = vmatprep.subr.bf16.mxu0 %v3552_v51  ;;  %v3608_v53 = vpack.c.bf16 %v1277_v52, %v1276_v27 }
 0x153   : > { %3569 = vmatprep.subr.bf16.mxu1 %v3568_v11 }
 0x155   : > { %3555 = vmatpush3.bf16.msra.mxu0 %v3552_v51  ;;  %v3604_v51 = vpack.c.bf16 %v1275_v7, %v1274_v46  ;;  %v1285_v46 = vld [vmem:[%s4056_s25 + $0x390] sm:$0xff]  ;;  %v1294_v7 = vld [vmem:[%s4056_s25 + $0x3d8] sm:$0xff] }
 0x156   : > { %3571 = vmatpush3.bf16.msra.mxu1 %v3568_v11  ;;  %3557 = vmatprep.subr.bf16.mxu0 %v3556_v3  ;;  %v1267_v11 = vld [vmem:[%s4056_s25 + $0x300] sm:$0xff] }
 0x157   : > { %3573 = vmatprep.subr.bf16.mxu1 %v3572_v29 }
 0x159   : > { %3559 = vmatpush3.bf16.msra.mxu0 %v3556_v3 }
 0x15a   : > { %3575 = vmatpush3.bf16.msra.mxu1 %v3572_v29  ;;  %3561 = vmatprep.subr.bf16.mxu0 %v3560_v57  ;;  %v3592_v29 = vpack.c.bf16 %v1268_v17, %v1267_v11 }
 0x15b   : > { %3577 = vmatprep.subr.bf16.mxu1 %v3576_v58 }
 0x15d   : > { %3563 = vmatpush3.bf16.msra.mxu0 %v3560_v57 }
 0x15e   : > { %3579 = vmatpush3.bf16.msra.mxu1 %v3576_v58  ;;  %3268 = vmatprep.subr.msk.mxu0 %vm1322_vm5, %v1251_v59 }
 0x15f   : > { %3289 = vmatprep.subr.msk.mxu1 %vm1322_vm5, %v1260_v61 }
 0x161   : > { %3269 = vmatpush3.msk.msra.mxu0 %vm1322_vm5, %v1251_v59  ;;  %v1280_v59 = vld [vmem:[%s4056_s25 + $0x368] sm:$0xff] }
 0x162   : > { %3290 = vmatpush3.msk.msra.mxu1 %vm1322_vm5, %v1260_v61  ;;  %3581 = vmatprep.subr.bf16.mxu0 %v3580_v63 }
 0x163   : > { %3597 = vmatprep.subr.bf16.mxu1 %v3596_v0 }
 0x182   : > { %v3779_v1 = vpop.permute.xlu0 %3778 }
 0x183   : > { %v3781_v28 = vunpack.i.h.bf16 %v3779_v1  ;;  %v3780_v43 = vunpack.i.l.bf16 %v3779_v1  ;;  %v3628_v1 = vpack.c.bf16 %v1289_v60, %v1288_v18  ;;  %v1299_v18 = vld [vmem:[%s4056_s25 + $0x400] sm:$0xff] }
 0x185   : > { %1125 = vst.msk [vmem:[#allocation2 + $0x90] sm:$0xff] %vm1106_vm7, %v3781_v28  ;;  %1123 = vst.msk [vmem:[#allocation2 + $0x80] sm:$0xff] %vm1106_vm7, %v3780_v43 }
 0x187   : > { %v3784_v5 = vpop.permute.xlu1 %3783  ;;  %v470_v6 = vpop.permute.xlu0 %469 }
 0x188   : > { %v3786_v8 = vunpack.i.h.bf16 %v3784_v5  ;;  %v3785_v9 = vunpack.i.l.bf16 %v3784_v5  ;;  %v557_v13 = vmul.f32 %v4472_v10, %v470_v6 }
 0x18a   : > { %1126 = vst.msk [vmem:[#allocation2 + $0x98] sm:$0xff] %vm1106_vm7, %v3786_v8  ;;  %1124 = vst.msk [vmem:[#allocation2 + $0x88] sm:$0xff] %vm1106_vm7, %v3785_v9  ;;  %v596_v25 = vadd.f32 %v4480_v16, %v557_v13 }
 0x18b   : > { %v481_v23 = vpop.permute.xlu1 %480  ;;  %v474_v24 = vpop.permute.xlu0 %473 }
 0x18c   : > { %v628_v26 = vmax.f32 %v596_v25, 0.0  ;;  %v559_v30 = vmul.f32 %v4472_v10, %v481_v23  ;;  %v558_v31 = vmul.f32 %v4472_v10, %v474_v24  ;;  %v1155_v38 = vld [vmem:[#allocation2 + $0x80] sm:$0xff]  ;;  %v1157_v12 = vld [vmem:[#allocation2 + $0x90] sm:$0xff]  ;;  %v1282_v23 = vld [vmem:[%s4056_s25 + $0x378] sm:$0xff] }
 0x18d   : > { %3270 = vmatprep.mubr.msk.f32.mxu0 %vm1315_vm10, %v1155_v38  ;;  %3291 = vmatprep.mubr.msk.f32.mxu1 %vm1315_vm10, %v1157_v12  ;;  %v1281_v25 = vld [vmem:[%s4056_s25 + $0x370] sm:$0xff]  ;;  %v1290_v24 = vld [vmem:[%s4056_s25 + $0x3b8] sm:$0xff] }
 0x18e   : > { %661 = vst.msk [vmem:[#allocation2 + $0xa0] sm:$0xff] %vm640_vm12, %v628_v26  ;;  %v598_v35 = vadd.f32 %v4480_v16, %v559_v30  ;;  %v597_v36 = vadd.f32 %v4480_v16, %v558_v31  ;;  %v1291_v26 = vld [vmem:[%s4056_s25 + $0x3c0] sm:$0xff]  ;;  %v3616_v33 = vpack.c.bf16 %v1282_v23, %v1281_v25 }
 0x18f   : > { %704 = vst.msk [vmem:[#allocation2 + $0xa0] sm:$0xff] %vm683_vm1, %v4172_v15  ;;  %v485_v37 = vpop.permute.xlu1 %484  ;;  %v3632_v41 = vpack.c.bf16 %v1291_v26, %v1290_v24 }
 0x190   : > { %v630_v22 = vmax.f32 %v598_v35, 0.0  ;;  %v629_v39 = vmax.f32 %v597_v36, 0.0  ;;  %v560_v40 = vmul.f32 %v4472_v10, %v485_v37  ;;  %v1283_v35 = vld [vmem:[%s4056_s25 + $0x380] sm:$0xff]  ;;  %v1284_v36 = vld [vmem:[%s4056_s25 + $0x388] sm:$0xff] }
 0x191   : > { %v1156_v47 = vld [vmem:[#allocation2 + $0x88] sm:$0xff]  ;;  %v1158_v48 = vld [vmem:[#allocation2 + $0x98] sm:$0xff]  ;;  %v3620_v44 = vpack.c.bf16 %v1284_v36, %v1283_v35  ;;  %v1303_v36 = vld [vmem:[%s4056_s25 + $0x420] sm:$0xff] }
 0x192   : > { %663 = vst.msk [vmem:[#allocation2 + $0xb0] sm:$0xff] %vm640_vm12, %v630_v22  ;;  %662 = vst.msk [vmem:[#allocation2 + $0xa8] sm:$0xff] %vm640_vm12, %v629_v39  ;;  %v599_v20 = vadd.f32 %v4480_v16, %v560_v40  ;;  %3271 = vmatmul.mubr.msk.f32.vlgmr.msra.gmra.mrb[8].mxu0 %vm1315_vm10, %v1156_v47  ;;  %3292 = vmatmul.mubr.msk.f32.vlgmr.msra.gmra.mrb[8].mxu1 %vm1315_vm10, %v1158_v48  ;;  %v1292_v37 = vld [vmem:[%s4056_s25 + $0x3c8] sm:$0xff]  ;;  %v1293_v39 = vld [vmem:[%s4056_s25 + $0x3d0] sm:$0xff] }
 0x193   : > { %706 = vst.msk [vmem:[#allocation2 + $0xb0] sm:$0xff] %vm683_vm1, %v4172_v15  ;;  %705 = vst.msk [vmem:[#allocation2 + $0xa8] sm:$0xff] %vm683_vm1, %v4170_v14  ;;  %3583 = vmatpush3.bf16.msra.mxu0 %v3580_v63  ;;  %3599 = vmatpush3.bf16.msra.mxu1 %v3596_v0  ;;  %v3612_v0 = vpack.c.bf16 %v1280_v59, %v1279_v56  ;;  %v3636_v45 = vpack.c.bf16 %v1293_v39, %v1292_v37  ;;  %v1286_v48 = vld [vmem:[%s4056_s25 + $0x398] sm:$0xff]  ;;  %v1296_v59 = vld [vmem:[%s4056_s25 + $0x3e8] sm:$0x1] }
 0x194   : > { %v631_v49 = vmax.f32 %v599_v20, 0.0  ;;  %3585 = vmatprep.subr.bf16.mxu0 %v3584_v21  ;;  %3601 = vmatprep.subr.bf16.mxu1 %v3600_v42  ;;  %v1295_v20 = vld [vmem:[%s4056_s25 + $0x3e0] sm:$0xff]  ;;  %v1304_v37 = vld [vmem:[%s4056_s25 + $0x428] sm:$0xff] }
 0x195   : > { %v3640_v11 = vpack.c.bf16 %v1295_v20, %v1294_v7 }
 0x196   : > { %664 = vst.msk [vmem:[#allocation2 + $0xb8] sm:$0xff] %vm640_vm12, %v631_v49  ;;  %v3789_v2 = vpop.permute.xlu0 %3788 }
 0x197   : > { %707 = vst.msk [vmem:[#allocation2 + $0xb8] sm:$0xff] %vm683_vm1, %v4170_v14  ;;  %3587 = vmatpush3.bf16.msra.mxu0 %v3584_v21  ;;  %3603 = vmatpush3.bf16.msra.mxu1 %v3600_v42  ;;  %v3791_v4 = vunpack.i.h.bf16 %v3789_v2  ;;  %v3790_v3 = vunpack.i.l.bf16 %v3789_v2 }
 0x198   : > { %3589 = vmatprep.subr.bf16.mxu0 %v3588_v50  ;;  %3605 = vmatprep.subr.bf16.mxu1 %v3604_v51 }
 0x199   : > { %1129 = vst.msk [vmem:[#allocation2 + $0xb0] sm:$0xff] %vm1106_vm7, %v3791_v4  ;;  %1127 = vst.msk [vmem:[#allocation2 + $0xa0] sm:$0xff] %vm1106_vm7, %v3790_v3  ;;  %v1297_v3 = vld [vmem:[%s4056_s25 + $0x3f0] sm:$0xff] }
 0x19a   : > { %v3794_v57 = vpop.permute.xlu1 %3793  ;;  %v492_v58 = vpop.permute.xlu0 %491 }
 0x19b   : > { %3591 = vmatpush3.bf16.msra.mxu0 %v3588_v50  ;;  %3607 = vmatpush3.bf16.msra.mxu1 %v3604_v51  ;;  %v3796_v61 = vunpack.i.h.bf16 %v3794_v57  ;;  %v3795_v19 = vunpack.i.l.bf16 %v3794_v57  ;;  %v561_v62 = vmul.f32 %v4472_v10, %v492_v58  ;;  %v3624_v51 = vpack.c.bf16 %v1286_v48, %v1285_v46  ;;  %v1287_v58 = vld [vmem:[%s4056_s25 + $0x3a0] sm:$0x1] }
 0x19c   : > { %3593 = vmatprep.subr.bf16.mxu0 %v3592_v29  ;;  %3609 = vmatprep.subr.bf16.mxu1 %v3608_v53 }
 0x19d   : > { %1130 = vst.msk [vmem:[#allocation2 + $0xb8] sm:$0xff] %vm1106_vm7, %v3796_v61  ;;  %1128 = vst.msk [vmem:[#allocation2 + $0xa8] sm:$0xff] %vm1106_vm7, %v3795_v19  ;;  %v600_v63 = vadd.f32 %v4480_v16, %v561_v62 }
 0x19f   : > { %3595 = vmatpush3.bf16.msra.mxu0 %v3592_v29  ;;  %3611 = vmatpush3.bf16.msra.mxu1 %v3608_v53  ;;  %v503_v28 = vpop.permute.xlu1 %502  ;;  %v496_v43 = vpop.permute.xlu0 %495  ;;  %v632_v8 = vmax.f32 %v600_v63, 0.0  ;;  %v1298_v53 = vld [vmem:[%s4056_s25 + $0x3f8] sm:$0xff] }
 0x1a0   : > { %3310 = vmatprep.subr.msk.mxu0 %vm1322_vm5, %v1269_v54  ;;  %3331 = vmatprep.subr.msk.mxu1 %vm1322_vm5, %v1278_v55  ;;  %v1159_v5 = vld [vmem:[#allocation2 + $0xa0] sm:$0xff]  ;;  %v1161_v6 = vld [vmem:[#allocation2 + $0xb0] sm:$0xff]  ;;  %v563_v9 = vmul.f32 %v4472_v10, %v503_v28  ;;  %v562_v13 = vmul.f32 %v4472_v10, %v496_v43  ;;  %v1308_v43 = vld [vmem:[%s4056_s25 + $0x448] sm:$0xff] }
 0x1a1   : > { %3312 = vmatprep.mubr.msk.f32.mxu0 %vm1315_vm10, %v1159_v5  ;;  %3333 = vmatprep.mubr.msk.f32.mxu1 %vm1315_vm10, %v1161_v6  ;;  %665 = vst.msk [vmem:[#allocation2 + $0xc0] sm:$0xff] %vm640_vm12, %v632_v8  ;;  %v1309_v5 = vld [vmem:[%s4056_s25 + $0x450] sm:$0xff] }
 0x1a2   : > { %v602_v30 = vadd.f32 %v4480_v16, %v563_v9  ;;  %v601_v31 = vadd.f32 %v4480_v16, %v562_v13  ;;  %708 = vst.msk [vmem:[#allocation2 + $0xc0] sm:$0xff] %vm683_vm1, %v4172_v15  ;;  %v3664_v26 = vpack.c.bf16 %v1309_v5, %v1308_v43 }
 0x1a3   : > { %3311 = vmatpush3.msk.msra.mxu0 %vm1322_vm5, %v1269_v54  ;;  %3332 = vmatpush3.msk.msra.mxu1 %vm1322_vm5, %v1278_v55  ;;  %v507_v32 = vpop.permute.xlu1 %506  ;;  %v1306_v54 = vld [vmem:[%s4056_s25 + $0x438] sm:$0xff]  ;;  %v1307_v55 = vld [vmem:[%s4056_s25 + $0x440] sm:$0xff] }
 0x1a4   : > { %3613 = vmatprep.subr.bf16.mxu0 %v3612_v0  ;;  %3629 = vmatprep.subr.bf16.mxu1 %v3628_v1  ;;  %v634_v34 = vmax.f32 %v602_v30, 0.0  ;;  %v633_v38 = vmax.f32 %v601_v31, 0.0  ;;  %v564_v12 = vmul.f32 %v4472_v10, %v507_v32  ;;  %v1160_v21 = vld [vmem:[#allocation2 + $0xa8] sm:$0xff]  ;;  %v1162_v22 = vld [vmem:[#allocation2 + $0xb8] sm:$0xff]  ;;  %v3660_v28 = vpack.c.bf16 %v1307_v55, %v1306_v54  ;;  %v1301_v30 = vld [vmem:[%s4056_s25 + $0x410] sm:$0xff] }
 0x1a5   : > { %3313 = vmatmul.mubr.msk.f32.vlgmr.msra.gmra.mrb[10].mxu0 %vm1315_vm10, %v1160_v21  ;;  %3334 = vmatmul.mubr.msk.f32.vlgmr.msra.gmra.mrb[10].mxu1 %vm1315_vm10, %v1162_v22  ;;  %v1302_v31 = vld [vmem:[%s4056_s25 + $0x418] sm:$0xff]  ;;  %v1313_v21 = vld [vmem:[%s4056_s25 + $0x470] sm:$0xff]  ;;  %v3656_v22 = vpack.c.bf16 %v1304_v37, %v1303_v36 }
 0x1a6   : > { %667 = vst.msk [vmem:[#allocation2 + $0xd0] sm:$0xff] %vm640_vm12, %v634_v34  ;;  %666 = vst.msk [vmem:[#allocation2 + $0xc8] sm:$0xff] %vm640_vm12, %v633_v38  ;;  %v603_v40 = vadd.f32 %v4480_v16, %v564_v12  ;;  %3615 = vmatpush3.bf16.msra.mxu0 %v3612_v0  ;;  %3631 = vmatpush3.bf16.msra.mxu1 %v3628_v1  ;;  %v1300_v0 = vld [vmem:[%s4056_s25 + $0x408] sm:$0xff]  ;;  %v3644_v1 = vpack.c.bf16 %v1298_v53, %v1297_v3  ;;  %v1310_v32 = vld [vmem:[%s4056_s25 + $0x458] sm:$0xff] }
 0x1a7   : > { %710 = vst.msk [vmem:[#allocation2 + $0xd0] sm:$0xff] %vm683_vm1, %v4172_v15  ;;  %709 = vst.msk [vmem:[#allocation2 + $0xc8] sm:$0xff] %vm683_vm1, %v4170_v14  ;;  %3617 = vmatprep.subr.bf16.mxu0 %v3616_v33  ;;  %3633 = vmatprep.subr.bf16.mxu1 %v3632_v41  ;;  %v3648_v13 = vpack.c.bf16 %v1300_v0, %v1299_v18  ;;  %v1311_v38 = vld [vmem:[%s4056_s25 + $0x460] sm:$0xff] }
 0x1a8   : > { %v635_v42 = vmax.f32 %v603_v40, 0.0  ;;  %v3668_v35 = vpack.c.bf16 %v1311_v38, %v1310_v32 }
 0x1aa   : > { %668 = vst.msk [vmem:[#allocation2 + $0xd8] sm:$0xff] %vm640_vm12, %v635_v42  ;;  %3619 = vmatpush3.bf16.msra.mxu0 %v3616_v33  ;;  %3635 = vmatpush3.bf16.msra.mxu1 %v3632_v41  ;;  %v3652_v41 = vpack.c.bf16 %v1302_v31, %v1301_v30 }
 0x1ab   : > { %711 = vst.msk [vmem:[#allocation2 + $0xd8] sm:$0xff] %vm683_vm1, %v4170_v14  ;;  %3621 = vmatprep.subr.bf16.mxu0 %v3620_v44  ;;  %3637 = vmatprep.subr.bf16.mxu1 %v3636_v45 }
 0x1ac   : > { %v3799_v47 = vpop.permute.xlu0 %3798 }
 0x1ad   : > { %v3801_v49 = vunpack.i.h.bf16 %v3799_v47  ;;  %v3800_v50 = vunpack.i.l.bf16 %v3799_v47  ;;  %v1314_v47 = vld [vmem:[%s4056_s25 + $0x478] sm:$0x1] }
 0x1ae   : > { %3623 = vmatpush3.bf16.msra.mxu0 %v3620_v44  ;;  %3639 = vmatpush3.bf16.msra.mxu1 %v3636_v45 }
 0x1af   : > { %1133 = vst.msk [vmem:[#allocation2 + $0xd0] sm:$0xff] %vm1106_vm7, %v3801_v49  ;;  %1131 = vst.msk [vmem:[#allocation2 + $0xc0] sm:$0xff] %vm1106_vm7, %v3800_v50  ;;  %3625 = vmatprep.subr.bf16.mxu0 %v3624_v51  ;;  %3641 = vmatprep.subr.bf16.mxu1 %v3640_v11 }
 0x1b1   : > { %v3804_v17 = vpop.permute.xlu1 %3803  ;;  %v514_v27 = vpop.permute.xlu0 %513 }
 0x1b2   : > { %v3806_v52 = vunpack.i.h.bf16 %v3804_v17  ;;  %v3805_v2 = vunpack.i.l.bf16 %v3804_v17  ;;  %v565_v4 = vmul.f32 %v4472_v10, %v514_v27  ;;  %3627 = vmatpush3.bf16.msra.mxu0 %v3624_v51  ;;  %3643 = vmatpush3.bf16.msra.mxu1 %v3640_v11 }
 0x1b3   : > { %3352 = vmatprep.subr.msk.mxu0 %vm1322_vm5, %v1287_v58  ;;  %3373 = vmatprep.subr.msk.mxu1 %vm1322_vm5, %v1296_v59 }
 0x1b4   : > { %1134 = vst.msk [vmem:[#allocation2 + $0xd8] sm:$0xff] %vm1106_vm7, %v3806_v52  ;;  %1132 = vst.msk [vmem:[#allocation2 + $0xc8] sm:$0xff] %vm1106_vm7, %v3805_v2  ;;  %v604_v29 = vadd.f32 %v4480_v16, %v565_v4 }
 0x1b5   : > { %v525_v56 = vpop.permute.xlu1 %524  ;;  %v518_v57 = vpop.permute.xlu0 %517 }
 0x1b6   : > { %v636_v60 = vmax.f32 %v604_v29, 0.0  ;;  %v567_v61 = vmul.f32 %v4472_v10, %v525_v56  ;;  %v566_v19 = vmul.f32 %v4472_v10, %v518_v57  ;;  %v1163_v62 = vld [vmem:[#allocation2 + $0xc0] sm:$0xff]  ;;  %v1165_v63 = vld [vmem:[#allocation2 + $0xd0] sm:$0xff]  ;;  %3353 = vmatpush3.msk.msra.mxu0 %vm1322_vm5, %v1287_v58  ;;  %3374 = vmatpush3.msk.msra.mxu1 %vm1322_vm5, %v1296_v59 }
 0x1b7   : > { %3354 = vmatprep.mubr.msk.f32.mxu0 %vm1315_vm10, %v1163_v62  ;;  %3375 = vmatprep.mubr.msk.f32.mxu1 %vm1315_vm10, %v1165_v63 }
 0x1b8   : > { %669 = vst.msk [vmem:[#allocation2 + $0xe0] sm:$0xff] %vm640_vm12, %v636_v60  ;;  %v606_v6 = vadd.f32 %v4480_v16, %v567_v61  ;;  %v605_v8 = vadd.f32 %v4480_v16, %v566_v19  ;;  %3645 = vmatprep.subr.bf16.mxu0 %v3644_v1  ;;  %3661 = vmatprep.subr.bf16.mxu1 %v3660_v28 }
 0x1b9   : > { %712 = vst.msk [vmem:[#allocation2 + $0xe0] sm:$0xff] %vm683_vm1, %v4172_v15  ;;  %v529_v9 = vpop.permute.xlu1 %528 }
 0x1ba   : > { %v638_v25 = vmax.f32 %v606_v6, 0.0  ;;  %v637_v23 = vmax.f32 %v605_v8, 0.0  ;;  %v568_v24 = vmul.f32 %v4472_v10, %v529_v9 }
 0x1bb   : > { %v1164_v33 = vld [vmem:[#allocation2 + $0xc8] sm:$0xff]  ;;  %v1166_v34 = vld [vmem:[#allocation2 + $0xd8] sm:$0xff] }
 0x1bc   : > { %671 = vst.msk [vmem:[#allocation2 + $0xf0] sm:$0xff] %vm640_vm12, %v638_v25  ;;  %670 = vst.msk [vmem:[#allocation2 + $0xe8] sm:$0xff] %vm640_vm12, %v637_v23  ;;  %v607_v10 = vadd.f32 %v4480_v16, %v568_v24  ;;  %3355 = vmatmul.mubr.msk.f32.vlgmr.msra.gmra.mrb[12].mxu0 %vm1315_vm10, %v1164_v33  ;;  %3376 = vmatmul.mubr.msk.f32.vlgmr.msra.gmra.mrb[12].mxu1 %vm1315_vm10, %v1166_v34  ;;  %v1312_v16 = vld [vmem:[%s4056_s25 + $0x468] sm:$0xff] }
 0x1bd   : > { %714 = vst.msk [vmem:[#allocation2 + $0xf0] sm:$0xff] %vm683_vm1, %v4172_v15  ;;  %713 = vst.msk [vmem:[#allocation2 + $0xe8] sm:$0xff] %vm683_vm1, %v4170_v14  ;;  %3647 = vmatpush3.bf16.msra.mxu0 %v3644_v1  ;;  %3663 = vmatpush3.bf16.msra.mxu1 %v3660_v28  ;;  %v3672_v39 = vpack.c.bf16 %v1313_v21, %v1312_v16 }
 0x1be   : > { %v639_v12 = vmax.f32 %v607_v10, 0.0  ;;  %3649 = vmatprep.subr.bf16.mxu0 %v3648_v13  ;;  %3665 = vmatprep.subr.bf16.mxu1 %v3664_v26  ;;  %v3809_v15 = vpop.permute.xlu0 %3808 }
 0x1bf   : > { %v3811_v40 = vunpack.i.h.bf16 %v3809_v15  ;;  %v3810_v42 = vunpack.i.l.bf16 %v3809_v15 }
 0x1c0   : > { %672 = vst.msk [vmem:[#allocation2 + $0xf8] sm:$0xff] %vm640_vm12, %v639_v12  ;;  %vm2661_vm12 = vcmask 523264  }
 0x1c1   : > { %715 = vst.msk [vmem:[#allocation2 + $0xf8] sm:$0xff] %vm683_vm1, %v4170_v14  ;;  %3651 = vmatpush3.bf16.msra.mxu0 %v3648_v13  ;;  %3667 = vmatpush3.bf16.msra.mxu1 %v3664_v26  ;;  %v1305_v14 = vld [vmem:[%s4056_s25 + $0x430] sm:$0x1] }
 0x1c2   : > { %3653 = vmatprep.subr.bf16.mxu0 %v3652_v41  ;;  %3669 = vmatprep.subr.bf16.mxu1 %v3668_v35  ;;  %1137 = vst.msk [vmem:[#allocation2 + $0xf0] sm:$0xff] %vm1106_vm7, %v3811_v40  ;;  %1135 = vst.msk [vmem:[#allocation2 + $0xe0] sm:$0xff] %vm1106_vm7, %v3810_v42 }
 0x1c3   : > { %v3814_v44 = vpop.permute.xlu1 %3813 }
 0x1c4   : > { %v3816_v45 = vunpack.i.h.bf16 %v3814_v44  ;;  %v3815_v46 = vunpack.i.l.bf16 %v3814_v44 }
 0x1c5   : > { %3655 = vmatpush3.bf16.msra.mxu0 %v3652_v41  ;;  %3671 = vmatpush3.bf16.msra.mxu1 %v3668_v35 }
 0x1c6   : > { %3657 = vmatprep.subr.bf16.mxu0 %v3656_v22  ;;  %3673 = vmatprep.subr.bf16.mxu1 %v3672_v39  ;;  %1138 = vst.msk [vmem:[#allocation2 + $0xf8] sm:$0xff] %vm1106_vm7, %v3816_v45  ;;  %1136 = vst.msk [vmem:[#allocation2 + $0xe8] sm:$0xff] %vm1106_vm7, %v3815_v46 }
 0x1c9   : > { %3659 = vmatpush3.bf16.msra.mxu0 %v3656_v22  ;;  %3675 = vmatpush3.bf16.msra.mxu1 %v3672_v39  ;;  %v1167_v48 = vld [vmem:[#allocation2 + $0xe0] sm:$0xff]  ;;  %v1169_v7 = vld [vmem:[#allocation2 + $0xf0] sm:$0xff] }
 0x1ca   : > { %3394 = vmatprep.subr.msk.mxu0 %vm1322_vm5, %v1305_v14  ;;  %3415 = vmatprep.subr.msk.mxu1 %vm1322_vm5, %v1314_v47 }
 0x1cb   : > { %3396 = vmatprep.mubr.msk.f32.mxu0 %vm1315_vm10, %v1167_v48  ;;  %3417 = vmatprep.mubr.msk.f32.mxu1 %vm1315_vm10, %v1169_v7 }
 0x1cd   : > { %3395 = vmatpush3.msk.msra.mxu0 %vm1322_vm5, %v1305_v14  ;;  %3416 = vmatpush3.msk.msra.mxu1 %vm1322_vm5, %v1314_v47  ;;  %v1168_v20 = vld [vmem:[#allocation2 + $0xe8] sm:$0xff]  ;;  %v1170_v49 = vld [vmem:[#allocation2 + $0xf8] sm:$0xff] }
 0x1ce   : > { %3397 = vmatmul.mubr.msk.f32.vlgmr.msra.gmra.mrb[14].mxu0 %vm1315_vm10, %v1168_v20  ;;  %3418 = vmatmul.mubr.msk.f32.vlgmr.msra.gmra.mrb[14].mxu1 %vm1315_vm10, %v1170_v49 }
 0x1e7   : > { %v3104_v50 = vpop.f32.mrb[0].mxu0  ;;  %v3125_v51 = vpop.f32.mrb[0].mxu1 }
 0x1e8   : > { %2663 = vst.msk [vmem:[%s4634_s16 + $0x8] sm:$0xff] %vm2661_vm12, %v3104_v50  ;;  %2665 = vst.msk [vmem:[%s4634_s16 + $0x18] sm:$0xff] %vm2661_vm12, %v3125_v51  ;;  %v1392_v11 = vpop.f32.mrb[1].mxu0  ;;  %v1476_v17 = vpop.f32.mrb[1].mxu1 }
 0x1e9   : > { %2662 = vst.msk [vmem:[%s4634_s16] sm:$0xff] %vm2661_vm12, %v1392_v11  ;;  %2664 = vst.msk [vmem:[%s4634_s16 + $0x10] sm:$0xff] %vm2661_vm12, %v1476_v17 }
 0x1fd   : > { %v3146_v27 = vpop.f32.mrb[2].mxu0  ;;  %v3167_v52 = vpop.f32.mrb[2].mxu1 }
 0x1fe   : > { %2667 = vst.msk [vmem:[%s4634_s16 + $0x28] sm:$0xff] %vm2661_vm12, %v3146_v27  ;;  %2669 = vst.msk [vmem:[%s4634_s16 + $0x38] sm:$0xff] %vm2661_vm12, %v3167_v52  ;;  %v1560_v2 = vpop.f32.mrb[3].mxu0  ;;  %v1644_v4 = vpop.f32.mrb[3].mxu1 }
 0x1ff   : > { %2666 = vst.msk [vmem:[%s4634_s16 + $0x20] sm:$0xff] %vm2661_vm12, %v1560_v2  ;;  %2668 = vst.msk [vmem:[%s4634_s16 + $0x30] sm:$0xff] %vm2661_vm12, %v1644_v4 }
 0x20f   : > { %v3188_v3 = vpop.f32.mrb[4].mxu0  ;;  %v3209_v29 = vpop.f32.mrb[4].mxu1 }
 0x210   : > { %2671 = vst.msk [vmem:[%s4634_s16 + $0x48] sm:$0xff] %vm2661_vm12, %v3188_v3  ;;  %2673 = vst.msk [vmem:[%s4634_s16 + $0x58] sm:$0xff] %vm2661_vm12, %v3209_v29  ;;  %v1728_v53 = vpop.f32.mrb[5].mxu0  ;;  %v1812_v54 = vpop.f32.mrb[5].mxu1 }
 0x211   : > { %2670 = vst.msk [vmem:[%s4634_s16 + $0x40] sm:$0xff] %vm2661_vm12, %v1728_v53  ;;  %2672 = vst.msk [vmem:[%s4634_s16 + $0x50] sm:$0xff] %vm2661_vm12, %v1812_v54 }
 0x222   : > { %v3230_v55 = vpop.f32.mrb[6].mxu0  ;;  %v3251_v56 = vpop.f32.mrb[6].mxu1 }
 0x223   : > { %2675 = vst.msk [vmem:[%s4634_s16 + $0x68] sm:$0xff] %vm2661_vm12, %v3230_v55  ;;  %2677 = vst.msk [vmem:[%s4634_s16 + $0x78] sm:$0xff] %vm2661_vm12, %v3251_v56  ;;  %v1896_v57 = vpop.f32.mrb[7].mxu0  ;;  %v1980_v58 = vpop.f32.mrb[7].mxu1 }
 0x224   : > { %2674 = vst.msk [vmem:[%s4634_s16 + $0x60] sm:$0xff] %vm2661_vm12, %v1896_v57  ;;  %2676 = vst.msk [vmem:[%s4634_s16 + $0x70] sm:$0xff] %vm2661_vm12, %v1980_v58 }
 0x265   : > { %v3272_v59 = vpop.f32.mrb[8].mxu0  ;;  %v3293_v18 = vpop.f32.mrb[8].mxu1 }
 0x266   : > { %2679 = vst.msk [vmem:[%s4634_s16 + $0x88] sm:$0xff] %vm2661_vm12, %v3272_v59  ;;  %2681 = vst.msk [vmem:[%s4634_s16 + $0x98] sm:$0xff] %vm2661_vm12, %v3293_v18  ;;  %v2064_v60 = vpop.f32.mrb[9].mxu0  ;;  %v2148_v61 = vpop.f32.mrb[9].mxu1 }
 0x267   : > { %2678 = vst.msk [vmem:[%s4634_s16 + $0x80] sm:$0xff] %vm2661_vm12, %v2064_v60  ;;  %2680 = vst.msk [vmem:[%s4634_s16 + $0x90] sm:$0xff] %vm2661_vm12, %v2148_v61 }
 0x278   : > { %v3314_v19 = vpop.f32.mrb[10].mxu0  ;;  %v3335_v62 = vpop.f32.mrb[10].mxu1 }
 0x279   : > { %2683 = vst.msk [vmem:[%s4634_s16 + $0xa8] sm:$0xff] %vm2661_vm12, %v3314_v19  ;;  %2685 = vst.msk [vmem:[%s4634_s16 + $0xb8] sm:$0xff] %vm2661_vm12, %v3335_v62  ;;  %v2232_v63 = vpop.f32.mrb[11].mxu0  ;;  %v2316_v0 = vpop.f32.mrb[11].mxu1 }
 0x27a   : > { %2682 = vst.msk [vmem:[%s4634_s16 + $0xa0] sm:$0xff] %vm2661_vm12, %v2232_v63  ;;  %2684 = vst.msk [vmem:[%s4634_s16 + $0xb0] sm:$0xff] %vm2661_vm12, %v2316_v0 }
 0x28f   : > { %v3356_v1 = vpop.f32.mrb[12].mxu0  ;;  %v3377_v28 = vpop.f32.mrb[12].mxu1 }
 0x290   : > { %2687 = vst.msk [vmem:[%s4634_s16 + $0xc8] sm:$0xff] %vm2661_vm12, %v3356_v1  ;;  %2689 = vst.msk [vmem:[%s4634_s16 + $0xd8] sm:$0xff] %vm2661_vm12, %v3377_v28  ;;  %v2400_v43 = vpop.f32.mrb[13].mxu0  ;;  %v2484_v5 = vpop.f32.mrb[13].mxu1 }
 0x291   : > { %2686 = vst.msk [vmem:[%s4634_s16 + $0xc0] sm:$0xff] %vm2661_vm12, %v2400_v43  ;;  %2688 = vst.msk [vmem:[%s4634_s16 + $0xd0] sm:$0xff] %vm2661_vm12, %v2484_v5 }
 0x2a1   : > { %v3398_v6 = vpop.f32.mrb[14].mxu0  ;;  %v3419_v8 = vpop.f32.mrb[14].mxu1 }
 0x2a2   : > { %2691 = vst.msk [vmem:[%s4634_s16 + $0xe8] sm:$0xff] %vm2661_vm12, %v3398_v6  ;;  %2693 = vst.msk [vmem:[%s4634_s16 + $0xf8] sm:$0xff] %vm2661_vm12, %v3419_v8  ;;  %v2568_v9 = vpop.f32.mrb[15].mxu0  ;;  %v2652_v13 = vpop.f32.mrb[15].mxu1 }
 0x2a3   : > { %2690 = vst.msk [vmem:[%s4634_s16 + $0xe0] sm:$0xff] %vm2661_vm12, %v2568_v9  ;;  %2692 = vst.msk [vmem:[%s4634_s16 + $0xf0] sm:$0xff] %vm2661_vm12, %v2652_v13 }
 0x2a4   : > { %3832 = shalt.err (!%p3829_p5)
}
 0x2a5   : > { %s3833_s11 = scalar_lea.hbm %s4697_s29, 4096  ;;  %s3837_s14 = scalar_lea.hbm %s4762_s5, 8192 }
 0x2a6   : > { %p3834_p6 = scmp.ne.s32.totalorder %s4697_s29, %s3833_s11  ;;  %p3838_p10 = scmp.lt.u32.totalorder %s4697_s29, %s4762_s5 }
 0x2a7   : > { %p3839_p11 = scmp.lt.u32.totalorder %s3837_s14, %s3833_s11  ;;  %p3841_p13 = scmp.lt.u32.totalorder %s3833_s11, %s4697_s29 }
 0x2a8   : > { %p3835_p7 = pnand %p3834_p6, %p3975_p4 }
 0x2a9   : > { %p3840_p12 = por %p3839_p11, %p3838_p10 }
 0x2aa   : > { %p3836_p9 = pneg %p3835_p7 }
 0x2ab   : > { %p3842_p0 = por %p3841_p13, %p3840_p12 }
 0x2ad   : > { %p3843_p1 = pnand %p3842_p0, %p3836_p9 }
 0x2af   : > { %3846 = shalt.err (!%p3843_p1)
}
 0x2b0   : > { %s3903_s17 = smov 128   ;;  %s3904_s25 = smov 8  }
 0x2b1   : > { %3677 = dma.vmem_to_hbm [thread:$0]  (%p3975_p4), %s4699_s24, 4096, %s4697_s29, %s4711_s21, %s3903_s17, %s3903_s17, %s3904_s25  }
 0x2b2 PF: > { %p3683_p2 = scmp.ge.s32.totalorder %s3897_s23, 2  ;;  %s2728_s27 = sand.u32 1, %s3877_s18  }
 0x2b3   : > { %s2729_s7 = scalar_lea.sflag [#allocation4], %s2728_s27 }
 0x2b4   : > { %p3680_p3 = pnand %p3683_p2, %p3982_p8 }
 0x2b6   : > { %3872 = dma.done.wait (!%p3680_p3), %s2729_s7, 4096  }
 0x2b7   : > { %3874 = vsyncadd (!%p3680_p3), %s2729_s7, 4294963200  ;;  %s18_s23 = sadd.s32 1, %s3897_s23   ;;  %s4765_s18 = smov %s3881_s19 }
 0x2b8   : > { %p15_p5 = scmp.ge.s32.totalorder %s18_s23, 4   ;;  %s4766_s19 = smov %s3885_s20 }
 0x2b9   : > { %s4767_s20 = smov %s3988_s6  ;;  %s4768_s21 = smov %s3893_s22 }
 0x2ba   : > { %s4769_s22 = smov %s4771_s26  ;;  %17 = sbr.rel (!%p15_p5) target bundleno = 4 (0x4), region = 81 }
 0x2c1   :  { %2734 = vsyncpa [#allocation4], 1 }
 0x2c2   :  { %2736 = vsyncpa [#allocation4 + $0x1], 1 }

</bundles_post_ra>
